<compile_context>
chip_gen: v5e
topology: v5e:2x2
jax: 0.10.0
libtpu: 0.0.40
codegen_flags: <defaults>
</compile_context>

<pallas_src>
import functools

import jax
import jax.numpy as jnp
from jax import lax
from jax.experimental import pallas as pl
from jax.experimental.pallas import tpu as pltpu

# ----------------------------- config (small) ------------------------------
B = 2                        # batch
IMG_C, IMG_H, IMG_W = 3, 16, 16
CONV_C = 16                  # conv output channels (logical)
FEAT = 64                    # CNN global feature dim (analog of 2048)
V = 16                       # number of template mesh vertices (scaled down)
EMBED = FEAT + 3             # per-vertex token dim (analog of 2051)
REDUCED = [FEAT // 2, FEAT // 4, FEAT // 8, 3]   # analog of [1024,512,256,3]
DTYPE = jnp.float32
WDTYPE = jnp.bfloat16        # weight storage / MXU input dtype

# padded (hardware-friendly) dims
DP = 128                     # padded token / feature lane width (67 -> 128)
K_PAD = 32                   # padded im2col contraction dim (27 -> 32)
C_PAD = 128                  # padded conv channel dim (16 -> 128)
N_TOK = B * V                # folded (batch * vertex) token rows
L = len(REDUCED)             # encoder layers

D_INS = tuple([EMBED] + REDUCED[:-1])                    # (67, 32, 16, 8)
SCALES = tuple(1.0 / float(d) ** 0.5 for d in D_INS)     # folded into Wq


# ------------------------------ Pallas kernel --------------------------------
def _metro_kernel(patch_ref, convw_ref, convb_ref, pool_ref, fcw_ref, fcb_ref,
                  verts_ref, mask_ref, wqkv_ref, redw_ref, redb_ref,
                  o_ref, h_ref, *, n_batch, n_vert, n_layers):
    """Fully fused Metro forward.

    grid = (L,) over encoder layers.  Step 0 additionally runs the CNN and
    builds the tokens into the persistent VMEM scratch `h_ref`; every step
    runs one encoder layer (fused-QKV attention + residual + reduce linear);
    the last step writes the output tile.
    """
    li = pl.program_id(0)

    # ---- step 0: CNN + token construction (feat + template vertices) ----
    @pl.when(li == 0)
    def _():
        conv = jnp.dot(patch_ref[...].astype(WDTYPE), convw_ref[...],
                       preferred_element_type=jnp.float32)      # (B*HW, C_PAD)
        conv = jnp.maximum(conv + convb_ref[...], 0.0)
        pooled = jnp.dot(pool_ref[...], conv,
                         preferred_element_type=jnp.float32)    # (B, C_PAD)
        feat = jnp.dot(pooled.astype(WDTYPE), fcw_ref[...],
                       preferred_element_type=jnp.float32) + fcb_ref[...]
        feat = jnp.maximum(feat, 0.0)                            # (B, DP)
        verts = verts_ref[...]                                   # (V, DP)
        for b in range(n_batch):                                 # tiny, unrolled
            h_ref[pl.ds(b * n_vert, n_vert), :] = verts + feat[b:b + 1, :]

    # ---- encoder layer li (weights streamed per grid step) ----
    h = h_ref[...]                                               # (n, DP) f32
    xw = jnp.dot(h.astype(WDTYPE), wqkv_ref[0],
                 preferred_element_type=jnp.float32)             # (n, 3*DP)
    q = xw[:, 0:DP]
    k = xw[:, DP:2 * DP]
    v = xw[:, 2 * DP:3 * DP]
    # q · kᵀ without an explicit transpose: contract last dims of both.
    s = lax.dot_general(q.astype(WDTYPE), k.astype(WDTYPE),
                        (((1,), (1,)), ((), ())),
                        preferred_element_type=jnp.float32)      # (n, n)
    s = s + mask_ref[...]                                        # block-diag mask
    s = s - jnp.max(s, axis=-1, keepdims=True)
    p = jnp.exp(s)
    p = p * pl.reciprocal(jnp.sum(p, axis=-1, keepdims=True), approx=True)
    attn = jnp.dot(p.astype(WDTYPE), v.astype(WDTYPE),
                   preferred_element_type=jnp.float32)
    h = h + attn                                                 # residual (f32)
    h = jnp.dot(h.astype(WDTYPE), redw_ref[0],
                preferred_element_type=jnp.float32) + redb_ref[0]

    is_last = li == (n_layers - 1)

    @pl.when(jnp.logical_not(is_last))
    def _():
        h_ref[...] = jnp.maximum(h, 0.0)                         # ReLU except last

    @pl.when(is_last)
    def _():
        o_ref[...] = h.astype(o_ref.dtype)                       # (n, DP)


def pallas_metro(patches, params):
    m = patches.shape[0]
    return pl.pallas_call(
        functools.partial(_metro_kernel, n_batch=B, n_vert=V, n_layers=L),
        out_shape=jax.ShapeDtypeStruct((N_TOK, DP), DTYPE),
        grid=(L,),
        in_specs=[
            pl.BlockSpec((m, K_PAD), lambda li: (0, 0)),          # im2col patches
            pl.BlockSpec((K_PAD, C_PAD), lambda li: (0, 0)),      # conv weight
            pl.BlockSpec((1, C_PAD), lambda li: (0, 0)),          # conv bias
            pl.BlockSpec((B, m), lambda li: (0, 0)),              # GAP matrix
            pl.BlockSpec((C_PAD, DP), lambda li: (0, 0)),         # FC weight
            pl.BlockSpec((1, DP), lambda li: (0, 0)),             # FC bias
            pl.BlockSpec((V, DP), lambda li: (0, 0)),             # template verts
            pl.BlockSpec((N_TOK, N_TOK), lambda li: (0, 0)),      # attn mask
            pl.BlockSpec((1, DP, 3 * DP), lambda li: (li, 0, 0)),  # per-layer QKV
            pl.BlockSpec((1, DP, DP), lambda li: (li, 0, 0)),      # per-layer reduce W
            pl.BlockSpec((1, 1, DP), lambda li: (li, 0, 0)),       # per-layer reduce b
        ],
        out_specs=pl.BlockSpec((N_TOK, DP), lambda li: (0, 0)),
        scratch_shapes=[pltpu.VMEM((N_TOK, DP), jnp.float32)],    # resident activations
        compiler_params=pltpu.CompilerParams(
            dimension_semantics=("arbitrary",)),
    )(patches, params["conv_w_pad"], params["conv_b_pad"], params["pool_mat"],
      params["fc_w_pad"], params["fc_b_pad"], params["verts_pad"],
      params["attn_mask"], params["wqkv_pad"], params["red_w_pad"],
      params["red_b_pad"])


# ------------------------------ JAX glue -------------------------------------
def im2col_3x3(x_nhwc, k_pad):
    """3x3, stride 1, pad 1 patch extraction. (B,H,W,C) -> (B*H*W, k_pad)."""
    Bn, H, W, C = x_nhwc.shape
    xp = jnp.pad(x_nhwc, ((0, 0), (1, 1), (1, 1), (0, 0)))
    patches = []
    for di in range(3):
        for dj in range(3):
            patches.append(xp[:, di:di + H, dj:dj + W, :])
    p = jnp.stack(patches, axis=-2).reshape(Bn * H * W, 9 * C)
    if k_pad > 9 * C:
        p = jnp.pad(p, ((0, 0), (0, k_pad - 9 * C)))
    return p


def conv_weight_to_matmul(w_oihw):
    """PyTorch conv weight (Cout, Cin, 3, 3) -> matmul weight (9*Cin, Cout)
    matching the (di, dj, cin) patch ordering of im2col_3x3."""
    Cout, Cin, kh, kw = w_oihw.shape
    return jnp.transpose(w_oihw, (2, 3, 1, 0)).reshape(kh * kw * Cin, Cout)


def metro_forward(params, imgs_nchw):
    Bn = imgs_nchw.shape[0]
    x = jnp.transpose(imgs_nchw, (0, 2, 3, 1))                   # NCHW -> NHWC
    patches = im2col_3x3(x, K_PAD)                               # (B*H*W, 32)
    out_pad = pallas_metro(patches, params)                      # (B*V, 128)
    return out_pad[:, :3].reshape(Bn, V, 3)                      # (B, V, 3)


# ------------------------------ params ---------------------------------------
def init_params(key):
    keys = jax.random.split(key, 4 + 4 * L)
    ki = iter(keys)

    def rnd(k, shape, fan_in):
        return jax.random.normal(k, shape, DTYPE) / jnp.sqrt(
            jnp.asarray(fan_in, DTYPE))

    params = {}

    # --- CNN (padded / packed for lane-friendly layout, bf16 weights) ---
    conv_w = rnd(next(ki), (CONV_C, IMG_C, 3, 3), 9 * IMG_C)     # PyTorch OIHW
    conv_w_mat = conv_weight_to_matmul(conv_w)                   # (27, 16)
    params["conv_w_pad"] = (jnp.zeros((K_PAD, C_PAD), DTYPE)
                            .at[:9 * IMG_C, :CONV_C].set(conv_w_mat)
                            ).astype(WDTYPE)
    params["conv_b_pad"] = jnp.zeros((1, C_PAD), DTYPE)          # zero bias

    fc_w = rnd(next(ki), (CONV_C, FEAT), CONV_C)
    # shifted to token cols 3..66 so adding the vertex template directly
    # yields [xyz | feat | 0] tokens.
    params["fc_w_pad"] = (jnp.zeros((C_PAD, DP), DTYPE)
                          .at[:CONV_C, 3:3 + FEAT].set(fc_w)).astype(WDTYPE)
    params["fc_b_pad"] = jnp.zeros((1, DP), DTYPE)               # zero bias

    # block-diagonal global-average-pool matrix: (B, B*HW)
    params["pool_mat"] = jnp.kron(
        jnp.eye(B, dtype=DTYPE),
        jnp.full((1, IMG_H * IMG_W), 1.0 / (IMG_H * IMG_W), DTYPE))

    # --- MeshPositionalEncoding template (synthetic, deterministic) ---
    # TODO(synk): SMPL template vertices come from a CSV in the original.
    verts = 0.1 * jax.random.normal(next(ki), (V, 3), DTYPE)
    params["verts_pad"] = jnp.zeros((V, DP), DTYPE).at[:, :3].set(verts)

    # --- block-diagonal (per-batch) attention mask, precomputed on host ---
    batch_id = jnp.repeat(jnp.arange(B), V)
    params["attn_mask"] = jnp.where(batch_id[:, None] == batch_id[None, :],
                                    0.0, -1e30).astype(DTYPE)    # (B*V, B*V)

    # --- MultiLayerEncoder: fused QKV + reduce-linear, zero-padded to 128 ---
    # softmax scale 1/sqrt(d_in) folded into Wq; weights stored bf16.
    wqkv_list, redw_list, redb_list = [], [], []
    for d_in, d_out, scale in zip(D_INS, REDUCED, SCALES):
        wq = rnd(next(ki), (d_in, d_in), d_in) * scale
        wk = rnd(next(ki), (d_in, d_in), d_in)
        wv = rnd(next(ki), (d_in, d_in), d_in)
        rw = rnd(next(ki), (d_in, d_out), d_in)
        wqkv = jnp.zeros((DP, 3 * DP), DTYPE)
        wqkv = wqkv.at[:d_in, 0:d_in].set(wq)
        wqkv = wqkv.at[:d_in, DP:DP + d_in].set(wk)
        wqkv = wqkv.at[:d_in, 2 * DP:2 * DP + d_in].set(wv)
        wqkv_list.append(wqkv)
        redw_list.append(jnp.zeros((DP, DP), DTYPE).at[:d_in, :d_out].set(rw))
        redb_list.append(jnp.zeros((1, DP), DTYPE))              # zero bias
    params["wqkv_pad"] = jnp.stack(wqkv_list).astype(WDTYPE)     # (4, 128, 384)
    params["red_w_pad"] = jnp.stack(redw_list).astype(WDTYPE)    # (4, 128, 128)
    params["red_b_pad"] = jnp.stack(redb_list)                   # (4, 1, 128) f32
    return params


# ------------------------------ main ------------------------------------------
if __name__ == "__main__":
    root = jax.random.PRNGKey(0)
    k_params, k_input = jax.random.split(root)
    params = init_params(k_params)
    # PyTorch-convention NCHW image batch.
    inputs = jax.random.normal(k_input, (B, IMG_C, IMG_H, IMG_W), DTYPE)

    out = jax.jit(metro_forward)(params, inputs)
    out = jax.block_until_ready(out)
    assert out.shape == (B, V, 3), out.shape
    assert jnp.all(jnp.isfinite(out))
    print("KERNEL_OK")
</pallas_src>

<mosaic_0001>
module attributes {stable_mosaic.version = 11 : i64} {
  func.func @_metro_kernel(%arg0: i32, %arg1: memref<512x32xf32, #tpu.memory_space<vmem>>, %arg2: memref<32x128xbf16, #tpu.memory_space<vmem>>, %arg3: memref<1x128xf32, #tpu.memory_space<vmem>>, %arg4: memref<2x512xf32, #tpu.memory_space<vmem>>, %arg5: memref<128x128xbf16, #tpu.memory_space<vmem>>, %arg6: memref<1x128xf32, #tpu.memory_space<vmem>>, %arg7: memref<16x128xf32, #tpu.memory_space<vmem>>, %arg8: memref<32x32xf32, #tpu.memory_space<vmem>>, %arg9: memref<1x128x384xbf16, #tpu.memory_space<vmem>>, %arg10: memref<1x128x128xbf16, #tpu.memory_space<vmem>>, %arg11: memref<1x1x128xf32, #tpu.memory_space<vmem>>, %arg12: memref<32x128xf32, #tpu.memory_space<vmem>>, %arg13: memref<32x128xf32, #tpu.memory_space<vmem>>) attributes {dimension_semantics = [#tpu.dimension_semantics<arbitrary>], iteration_bounds = array<i64: 4>, scalar_prefetch = 0 : i64, scratch_operands = 1 : i64, tpu.core_type = #tpu.core_type<tc>, window_params = [{pipeline_mode = #tpu.pipeline_mode<synchronous>, transform_indices = @transform_0, window_bounds = array<i64: 512, 32>}, {pipeline_mode = #tpu.pipeline_mode<synchronous>, transform_indices = @transform_1, window_bounds = array<i64: 32, 128>}, {pipeline_mode = #tpu.pipeline_mode<synchronous>, transform_indices = @transform_2, window_bounds = array<i64: 1, 128>}, {pipeline_mode = #tpu.pipeline_mode<synchronous>, transform_indices = @transform_3, window_bounds = array<i64: 2, 512>}, {pipeline_mode = #tpu.pipeline_mode<synchronous>, transform_indices = @transform_4, window_bounds = array<i64: 128, 128>}, {pipeline_mode = #tpu.pipeline_mode<synchronous>, transform_indices = @transform_5, window_bounds = array<i64: 1, 128>}, {pipeline_mode = #tpu.pipeline_mode<synchronous>, transform_indices = @transform_6, window_bounds = array<i64: 16, 128>}, {pipeline_mode = #tpu.pipeline_mode<synchronous>, transform_indices = @transform_7, window_bounds = array<i64: 32, 32>}, {transform_indices = @transform_8, window_bounds = array<i64: 1, 128, 384>}, {transform_indices = @transform_9, window_bounds = array<i64: 1, 128, 128>}, {transform_indices = @transform_10, window_bounds = array<i64: 1, 1, 128>}, {pipeline_mode = #tpu.pipeline_mode<synchronous>, transform_indices = @transform_11, window_bounds = array<i64: 32, 128>}]} {
    %c0_i32 = arith.constant 0 : i32
    %0 = arith.cmpi eq, %arg0, %c0_i32 : i32
    %1 = arith.extui %0 : i1 to i32
    %c0_i32_0 = arith.constant 0 : i32
    %2 = arith.cmpi ne, %1, %c0_i32_0 : i32
    scf.if %2 {
      %c0_20 = arith.constant 0 : index
      %c0_21 = arith.constant 0 : index
      %44 = vector.load %arg1[%c0_20, %c0_21] : memref<512x32xf32, #tpu.memory_space<vmem>>, vector<512x32xf32>
      %45 = arith.truncf %44 : vector<512x32xf32> to vector<512x32xbf16>
      %c0_22 = arith.constant 0 : index
      %c0_23 = arith.constant 0 : index
      %46 = vector.load %arg2[%c0_22, %c0_23] : memref<32x128xbf16, #tpu.memory_space<vmem>>, vector<32x128xbf16>
      %cst_24 = arith.constant dense<0.000000e+00> : vector<512x128xf32>
      %47 = tpu.matmul %45, %46, %cst_24 {dimension_numbers = #tpu.dot_dimension_numbers<[1], [0], [0], [1], [0, 0, 1, 1], [], []>} : vector<512x32xbf16>, vector<32x128xbf16>, vector<512x128xf32> -> vector<512x128xf32>
      %c0_25 = arith.constant 0 : index
      %c0_26 = arith.constant 0 : index
      %48 = vector.load %arg3[%c0_25, %c0_26] : memref<1x128xf32, #tpu.memory_space<vmem>>, vector<1x128xf32>
      %49 = vector.broadcast %48 : vector<1x128xf32> to vector<512x128xf32>
      %50 = arith.addf %47, %49 : vector<512x128xf32>
      %cst_27 = arith.constant 0.000000e+00 : f32
      %51 = vector.broadcast %cst_27 : f32 to vector<512x128xf32>
      %52 = arith.maximumf %50, %51 : vector<512x128xf32>
      %c0_28 = arith.constant 0 : index
      %c0_29 = arith.constant 0 : index
      %53 = vector.load %arg4[%c0_28, %c0_29] : memref<2x512xf32, #tpu.memory_space<vmem>>, vector<2x512xf32>
      %cst_30 = arith.constant dense<0.000000e+00> : vector<2x128xf32>
      %54 = tpu.matmul %53, %52, %cst_30 {dimension_numbers = #tpu.dot_dimension_numbers<[1], [0], [0], [1], [0, 0, 1, 1], [], []>} : vector<2x512xf32>, vector<512x128xf32>, vector<2x128xf32> -> vector<2x128xf32>
      %55 = arith.truncf %54 : vector<2x128xf32> to vector<2x128xbf16>
      %c0_31 = arith.constant 0 : index
      %c0_32 = arith.constant 0 : index
      %56 = vector.load %arg5[%c0_31, %c0_32] : memref<128x128xbf16, #tpu.memory_space<vmem>>, vector<128x128xbf16>
      %cst_33 = arith.constant dense<0.000000e+00> : vector<2x128xf32>
      %57 = tpu.matmul %55, %56, %cst_33 {dimension_numbers = #tpu.dot_dimension_numbers<[1], [0], [0], [1], [0, 0, 1, 1], [], []>} : vector<2x128xbf16>, vector<128x128xbf16>, vector<2x128xf32> -> vector<2x128xf32>
      %c0_34 = arith.constant 0 : index
      %c0_35 = arith.constant 0 : index
      %58 = vector.load %arg6[%c0_34, %c0_35] : memref<1x128xf32, #tpu.memory_space<vmem>>, vector<1x128xf32>
      %59 = vector.broadcast %58 : vector<1x128xf32> to vector<2x128xf32>
      %60 = arith.addf %57, %59 : vector<2x128xf32>
      %cst_36 = arith.constant 0.000000e+00 : f32
      %61 = vector.broadcast %cst_36 : f32 to vector<2x128xf32>
      %62 = arith.maximumf %60, %61 : vector<2x128xf32>
      %c0_37 = arith.constant 0 : index
      %c0_38 = arith.constant 0 : index
      %63 = vector.load %arg7[%c0_37, %c0_38] : memref<16x128xf32, #tpu.memory_space<vmem>>, vector<16x128xf32>
      %64 = vector.extract_strided_slice %62 {offsets = [0, 0], sizes = [1, 128], strides = [1, 1]} : vector<2x128xf32> to vector<1x128xf32>
      %65 = vector.broadcast %64 : vector<1x128xf32> to vector<16x128xf32>
      %66 = arith.addf %63, %65 : vector<16x128xf32>
      %c0_39 = arith.constant 0 : index
      %c0_40 = arith.constant 0 : index
      %67 = vector.load %arg13[%c0_39, %c0_40] : memref<32x128xf32, #tpu.memory_space<vmem>>, vector<16x128xf32>
      tpu.vector_store %arg13[%c0_39, %c0_40], %66 {strides = array<i32>} : memref<32x128xf32, #tpu.memory_space<vmem>>, vector<16x128xf32>,
      %68 = vector.extract_strided_slice %62 {offsets = [1, 0], sizes = [1, 128], strides = [1, 1]} : vector<2x128xf32> to vector<1x128xf32>
      %69 = vector.broadcast %68 : vector<1x128xf32> to vector<16x128xf32>
      %70 = arith.addf %63, %69 : vector<16x128xf32>
      %c16 = arith.constant 16 : index
      %c0_41 = arith.constant 0 : index
      %71 = vector.load %arg13[%c16, %c0_41] : memref<32x128xf32, #tpu.memory_space<vmem>>, vector<16x128xf32>
      tpu.vector_store %arg13[%c16, %c0_41], %70 {strides = array<i32>} : memref<32x128xf32, #tpu.memory_space<vmem>>, vector<16x128xf32>,
    } else {
    }
    %c0 = arith.constant 0 : index
    %c0_1 = arith.constant 0 : index
    %3 = vector.load %arg13[%c0, %c0_1] : memref<32x128xf32, #tpu.memory_space<vmem>>, vector<32x128xf32>
    %4 = arith.truncf %3 : vector<32x128xf32> to vector<32x128xbf16>
    %c0_2 = arith.constant 0 : index
    %c0_3 = arith.constant 0 : index
    %c0_4 = arith.constant 0 : index
    %5 = vector.load %arg9[%c0_2, %c0_3, %c0_4] : memref<1x128x384xbf16, #tpu.memory_space<vmem>>, vector<1x128x384xbf16>
    %6 = vector.shape_cast %5 : vector<1x128x384xbf16> to vector<128x384xbf16>
    %cst = arith.constant dense<0.000000e+00> : vector<32x384xf32>
    %7 = tpu.matmul %4, %6, %cst {dimension_numbers = #tpu.dot_dimension_numbers<[1], [0], [0], [1], [0, 0, 1, 1], [], []>} : vector<32x128xbf16>, vector<128x384xbf16>, vector<32x384xf32> -> vector<32x384xf32>
    %8 = vector.extract_strided_slice %7 {offsets = [0, 0], sizes = [32, 128], strides = [1, 1]} : vector<32x384xf32> to vector<32x128xf32>
    %9 = vector.extract_strided_slice %7 {offsets = [0, 128], sizes = [32, 128], strides = [1, 1]} : vector<32x384xf32> to vector<32x128xf32>
    %10 = vector.extract_strided_slice %7 {offsets = [0, 256], sizes = [32, 128], strides = [1, 1]} : vector<32x384xf32> to vector<32x128xf32>
    %11 = arith.truncf %8 : vector<32x128xf32> to vector<32x128xbf16>
    %12 = arith.truncf %9 : vector<32x128xf32> to vector<32x128xbf16>
    %cst_5 = arith.constant dense<0.000000e+00> : vector<32x32xf32>
    %13 = tpu.matmul %11, %12, %cst_5 {dimension_numbers = #tpu.dot_dimension_numbers<[1], [1], [0], [0], [0, 0, 1, 0], [], []>} : vector<32x128xbf16>, vector<32x128xbf16>, vector<32x32xf32> -> vector<32x32xf32>
    %c0_6 = arith.constant 0 : index
    %c0_7 = arith.constant 0 : index
    %14 = vector.load %arg8[%c0_6, %c0_7] : memref<32x32xf32, #tpu.memory_space<vmem>>, vector<32x32xf32>
    %15 = arith.addf %13, %14 : vector<32x32xf32>
    %cst_8 = arith.constant dense<0xFF800000> : vector<32xf32>
    %16 = vector.multi_reduction <maximumf>, %15, %cst_8 [1] : vector<32x32xf32> to vector<32xf32>
    %17 = vector.shape_cast %16 : vector<32xf32> to vector<32x1xf32>
    %18 = vector.broadcast %17 : vector<32x1xf32> to vector<32x32xf32>
    %19 = arith.subf %15, %18 : vector<32x32xf32>
    %20 = math.exp %19 : vector<32x32xf32>
    %cst_9 = arith.constant dense<0.000000e+00> : vector<32xf32>
    %21 = vector.multi_reduction <add>, %20, %cst_9 [1] : vector<32x32xf32> to vector<32xf32>
    %22 = vector.shape_cast %21 : vector<32xf32> to vector<32x1xf32>
    %23 = tpu.reciprocal %22 {approx = true} : vector<32x1xf32> -> vector<32x1xf32>
    %24 = vector.broadcast %23 : vector<32x1xf32> to vector<32x32xf32>
    %25 = arith.mulf %20, %24 : vector<32x32xf32>
    %26 = arith.truncf %25 : vector<32x32xf32> to vector<32x32xbf16>
    %27 = arith.truncf %10 : vector<32x128xf32> to vector<32x128xbf16>
    %cst_10 = arith.constant dense<0.000000e+00> : vector<32x128xf32>
    %28 = tpu.matmul %26, %27, %cst_10 {dimension_numbers = #tpu.dot_dimension_numbers<[1], [0], [0], [1], [0, 0, 1, 1], [], []>} : vector<32x32xbf16>, vector<32x128xbf16>, vector<32x128xf32> -> vector<32x128xf32>
    %29 = arith.addf %3, %28 : vector<32x128xf32>
    %30 = arith.truncf %29 : vector<32x128xf32> to vector<32x128xbf16>
    %c0_11 = arith.constant 0 : index
    %c0_12 = arith.constant 0 : index
    %c0_13 = arith.constant 0 : index
    %31 = vector.load %arg10[%c0_11, %c0_12, %c0_13] : memref<1x128x128xbf16, #tpu.memory_space<vmem>>, vector<1x128x128xbf16>
    %32 = vector.shape_cast %31 : vector<1x128x128xbf16> to vector<128x128xbf16>
    %cst_14 = arith.constant dense<0.000000e+00> : vector<32x128xf32>
    %33 = tpu.matmul %30, %32, %cst_14 {dimension_numbers = #tpu.dot_dimension_numbers<[1], [0], [0], [1], [0, 0, 1, 1], [], []>} : vector<32x128xbf16>, vector<128x128xbf16>, vector<32x128xf32> -> vector<32x128xf32>
    %c0_15 = arith.constant 0 : index
    %c0_16 = arith.constant 0 : index
    %c0_17 = arith.constant 0 : index
    %34 = vector.load %arg11[%c0_15, %c0_16, %c0_17] : memref<1x1x128xf32, #tpu.memory_space<vmem>>, vector<1x1x128xf32>
    %35 = vector.shape_cast %34 : vector<1x1x128xf32> to vector<1x128xf32>
    %36 = vector.broadcast %35 : vector<1x128xf32> to vector<32x128xf32>
    %37 = arith.addf %33, %36 : vector<32x128xf32>
    %c3_i32 = arith.constant 3 : i32
    %38 = arith.cmpi eq, %arg0, %c3_i32 : i32
    %true = arith.constant true
    %39 = arith.xori %38, %true : i1
    %40 = arith.extui %39 : i1 to i32
    %c0_i32_18 = arith.constant 0 : i32
    %41 = arith.cmpi ne, %40, %c0_i32_18 : i32
    scf.if %41 {
      %cst_20 = arith.constant 0.000000e+00 : f32
      %44 = vector.broadcast %cst_20 : f32 to vector<32x128xf32>
      %45 = arith.maximumf %37, %44 : vector<32x128xf32>
      %c0_21 = arith.constant 0 : index
      %c0_22 = arith.constant 0 : index
      %46 = vector.load %arg13[%c0_21, %c0_22] : memref<32x128xf32, #tpu.memory_space<vmem>>, vector<32x128xf32>
      tpu.vector_store %arg13[%c0_21, %c0_22], %45 {strides = array<i32>} : memref<32x128xf32, #tpu.memory_space<vmem>>, vector<32x128xf32>,
    } else {
    }
    %42 = arith.extui %38 : i1 to i32
    %c0_i32_19 = arith.constant 0 : i32
    %43 = arith.cmpi ne, %42, %c0_i32_19 : i32
    scf.if %43 {
      %c0_20 = arith.constant 0 : index
      %c0_21 = arith.constant 0 : index
      %44 = vector.load %arg12[%c0_20, %c0_21] : memref<32x128xf32, #tpu.memory_space<vmem>>, vector<32x128xf32>
      tpu.vector_store %arg12[%c0_20, %c0_21], %37 {strides = array<i32>} : memref<32x128xf32, #tpu.memory_space<vmem>>, vector<32x128xf32>,
    } else {
    }
    return
  }
  func.func @transform_0(%arg0: i32) -> (i32, i32) {
    %c0_i32 = arith.constant 0 : i32
    %c0_i32_0 = arith.constant 0 : i32
    %c0_i32_1 = arith.constant 0 : i32
    return %c0_i32, %c0_i32_0 : i32, i32
  }
  func.func @transform_1(%arg0: i32) -> (i32, i32) {
    %c0_i32 = arith.constant 0 : i32
    %c0_i32_0 = arith.constant 0 : i32
    %c0_i32_1 = arith.constant 0 : i32
    return %c0_i32, %c0_i32_0 : i32, i32
  }
  func.func @transform_2(%arg0: i32) -> (i32, i32) {
    %c0_i32 = arith.constant 0 : i32
    %c0_i32_0 = arith.constant 0 : i32
    %c0_i32_1 = arith.constant 0 : i32
    return %c0_i32, %c0_i32_0 : i32, i32
  }
  func.func @transform_3(%arg0: i32) -> (i32, i32) {
    %c0_i32 = arith.constant 0 : i32
    %c0_i32_0 = arith.constant 0 : i32
    %c0_i32_1 = arith.constant 0 : i32
    return %c0_i32, %c0_i32_0 : i32, i32
  }
  func.func @transform_4(%arg0: i32) -> (i32, i32) {
    %c0_i32 = arith.constant 0 : i32
    %c0_i32_0 = arith.constant 0 : i32
    %c0_i32_1 = arith.constant 0 : i32
    return %c0_i32, %c0_i32_0 : i32, i32
  }
  func.func @transform_5(%arg0: i32) -> (i32, i32) {
    %c0_i32 = arith.constant 0 : i32
    %c0_i32_0 = arith.constant 0 : i32
    %c0_i32_1 = arith.constant 0 : i32
    return %c0_i32, %c0_i32_0 : i32, i32
  }
  func.func @transform_6(%arg0: i32) -> (i32, i32) {
    %c0_i32 = arith.constant 0 : i32
    %c0_i32_0 = arith.constant 0 : i32
    %c0_i32_1 = arith.constant 0 : i32
    return %c0_i32, %c0_i32_0 : i32, i32
  }
  func.func @transform_7(%arg0: i32) -> (i32, i32) {
    %c0_i32 = arith.constant 0 : i32
    %c0_i32_0 = arith.constant 0 : i32
    %c0_i32_1 = arith.constant 0 : i32
    return %c0_i32, %c0_i32_0 : i32, i32
  }
  func.func @transform_8(%arg0: i32) -> (i32, i32, i32) {
    %c0_i32 = arith.constant 0 : i32
    %c0_i32_0 = arith.constant 0 : i32
    %c0_i32_1 = arith.constant 0 : i32
    return %arg0, %c0_i32, %c0_i32_0 : i32, i32, i32
  }
  func.func @transform_9(%arg0: i32) -> (i32, i32, i32) {
    %c0_i32 = arith.constant 0 : i32
    %c0_i32_0 = arith.constant 0 : i32
    %c0_i32_1 = arith.constant 0 : i32
    return %arg0, %c0_i32, %c0_i32_0 : i32, i32, i32
  }
  func.func @transform_10(%arg0: i32) -> (i32, i32, i32) {
    %c0_i32 = arith.constant 0 : i32
    %c0_i32_0 = arith.constant 0 : i32
    %c0_i32_1 = arith.constant 0 : i32
    return %arg0, %c0_i32, %c0_i32_0 : i32, i32, i32
  }
  func.func @transform_11(%arg0: i32) -> (i32, i32) {
    %c0_i32 = arith.constant 0 : i32
    %c0_i32_0 = arith.constant 0 : i32
    %c0_i32_1 = arith.constant 0 : i32
    return %c0_i32, %c0_i32_0 : i32, i32
  }
}

</mosaic_0001>

<bundles_post_ra>
// kernel: metro_forward.1
= control target key start
LH: loop header
LB: loop body
LE: loop exit
PB: predicated region body
PF: predicated region fallthrough
CT: control target
= control target key end

     0   :  { %s1896_s17 = smov 0   ;;  %s2475_s0 = inlined_call_operand.vmem [shape: f32[512,32], index: 0, kind: input, shape index: {}]   ;;  %s2476_s1 = inlined_call_operand.vmem [shape: bf16[32,128], index: 1, kind: input, shape index: {}]   ;;  %s2477_s2 = inlined_call_operand.vmem [shape: f32[1,128], index: 2, kind: input, shape index: {}]   ;;  %s2478_s3 = inlined_call_operand.vmem [shape: f32[2,512], index: 3, kind: input, shape index: {}]   ;;  %s2479_s4 = inlined_call_operand.vmem [shape: bf16[128,128], index: 4, kind: input, shape index: {}]   ;;  %s2480_s5 = inlined_call_operand.vmem [shape: f32[1,128], index: 5, kind: input, shape index: {}]   ;;  %s2481_s6 = inlined_call_operand.vmem [shape: f32[16,128], index: 6, kind: input, shape index: {}]   ;;  %s2482_s7 = inlined_call_operand.vmem [shape: f32[32,32], index: 7, kind: input, shape index: {}]   ;;  %s2483_s8 = inlined_call_operand.vmem [shape: bf16[4,128,384], index: 8, kind: input, shape index: {}]   ;;  %s2484_s9 = inlined_call_operand.vmem [shape: bf16[4,128,128], index: 9, kind: input, shape index: {}]   ;;  %s2485_s10 = inlined_call_operand.vmem [shape: f32[4,1,128], index: 10, kind: input, shape index: {}]   ;;  %s2486_s11 = inlined_call_operand.vmem [shape: f32[32,128], index: 11, kind: output, shape index: {}]  }
   0x1 LB: > { %s1902_s18 = sadd.s32 4294967295, %s1834_s17   ;;  %p1532_p0 = scmp.ge.s32.totalorder %s1834_s17, 1  ;;  %s1834_s17 = sphi %s1896_s17, %s21_s17  }
   0x2   : > { %p350_p1 = scmp.lt.s32.totalorder %s1834_s17, 5 }
   0x4   : > { %p351_p2 = pnand %p1532_p0, %p350_p1 }
   0x5   : > { %p393_p3 = scmp.lt.s32.totalorder (!%p351_p2), %s1902_s18, 3  ;;  %p1536_p4 = scmp.ne.s32.totalorder (!%p351_p2), %s1902_s18, 0 }
   0x6   : > { %354 = sbr.rel (%p351_p2) target bundleno = 1530 (0x5fa), region = 64 }
   0xb   : > { %s1908_s19 = scalar_select %p393_p3, %s1902_s18, 3 }
   0xc   : > { %410 = sbr.rel (%p1536_p4) target bundleno = 619 (0x26b), region = 68 }
   0xd   : > { %s1800_s20 = smul.u32 192, %s1908_s19  ;;  %s1743_s21 = sshll.u32 %s1908_s19, 6 }
   0xe   : > { %s1915_s24 = scalar_lea.vmem %s2484_s9, %s1743_s21  ;;  %s405_s27 = scalar_lea.vmem %s2485_s10, %s1908_s19 }
   0xf   : > { %s1924_s30 = scalar_lea.vmem %s2483_s8, %s1800_s20 }
  0x11   : > { %v1745_v0 = vld [vmem:[%s2476_s1 + $0x8] sm:$0xff]  ;;  %v1744_v1 = vld [vmem:[%s2476_s1] sm:$0xff]  ;;  %v433_v4 = vld [vmem:[%s2475_s0 + $0xb0] sm:$0xff]  ;;  %vm527_vm0 = vcmask 261120  }
  0x12   : > { %v411_v2 = vld [vmem:[%s2475_s0] sm:$0xff]  ;;  %v412_v3 = vld [vmem:[%s2475_s0 + $0x8] sm:$0xff]  ;;  %630 = vmatpush.bf16.msra.mxu0 %v1745_v0  ;;  %1786 = vmatpush.bf16.msra.mxu1 %v1745_v0  ;;  %v434_v5 = vld [vmem:[%s2475_s0 + $0xb8] sm:$0xff] }
  0x13   : > { %v447_v6 = vld [vmem:[%s2475_s0 + $0x120] sm:$0xff]  ;;  %1787 = vmatpush.bf16.msra.mxu2 %v1745_v0  ;;  %1788 = vmatpush.bf16.msra.mxu3 %v1745_v0  ;;  %v448_v7 = vld [vmem:[%s2475_s0 + $0x128] sm:$0xff]  ;;  %v475_v10 = vpack.c.bf16 %v412_v3, %v411_v2  ;;  %v486_v11 = vpack.c.bf16 %v434_v5, %v433_v4  ;;  %v413_v14 = vld [vmem:[%s2475_s0 + $0x10] sm:$0xff] }
  0x14   : > { %v455_v8 = vld [vmem:[%s2475_s0 + $0x160] sm:$0xff]  ;;  %v456_v9 = vld [vmem:[%s2475_s0 + $0x168] sm:$0xff]  ;;  %v493_v12 = vpack.c.bf16 %v448_v7, %v447_v6  ;;  %v414_v15 = vld [vmem:[%s2475_s0 + $0x18] sm:$0xff] }
  0x15   : > { %v497_v13 = vpack.c.bf16 %v456_v9, %v455_v8  ;;  %v435_v16 = vld [vmem:[%s2475_s0 + $0xc0] sm:$0xff]  ;;  %v436_v17 = vld [vmem:[%s2475_s0 + $0xc8] sm:$0xff]  ;;  %v449_v18 = vld [vmem:[%s2475_s0 + $0x130] sm:$0xff]  ;;  %v476_v22 = vpack.c.bf16 %v414_v15, %v413_v14 }
  0x16   : > { %631 = vmatpush.bf16.msra.mxu0 %v1744_v1  ;;  %1789 = vmatpush.bf16.msra.mxu1 %v1744_v1  ;;  %v450_v19 = vld [vmem:[%s2475_s0 + $0x138] sm:$0xff]  ;;  %v457_v20 = vld [vmem:[%s2475_s0 + $0x170] sm:$0xff]  ;;  %v487_v23 = vpack.c.bf16 %v436_v17, %v435_v16  ;;  %v415_v26 = vld [vmem:[%s2475_s0 + $0x20] sm:$0xff] }
  0x17   : > { %1790 = vmatpush.bf16.msra.mxu2 %v1744_v1  ;;  %1791 = vmatpush.bf16.msra.mxu3 %v1744_v1  ;;  %v458_v21 = vld [vmem:[%s2475_s0 + $0x178] sm:$0xff]  ;;  %v494_v24 = vpack.c.bf16 %v450_v19, %v449_v18  ;;  %v416_v27 = vld [vmem:[%s2475_s0 + $0x28] sm:$0xff]  ;;  %v437_v28 = vld [vmem:[%s2475_s0 + $0xd0] sm:$0xff] }
  0x18   : > { %v498_v25 = vpack.c.bf16 %v458_v21, %v457_v20  ;;  %v438_v29 = vld [vmem:[%s2475_s0 + $0xd8] sm:$0xff]  ;;  %v459_v30 = vld [vmem:[%s2475_s0 + $0x180] sm:$0xff]  ;;  %v452_v32 = vld [vmem:[%s2475_s0 + $0x148] sm:$0xff]  ;;  %v477_v34 = vpack.c.bf16 %v416_v27, %v415_v26 }
  0x19   : > { %1545 = vmatmul.msk.bf16.vlgmr.msra.gmra.mxu0 %vm527_vm0, %v475_v10  ;;  %1556 = vmatmul.msk.bf16.vlgmr.msra.gmra.mxu1 %vm527_vm0, %v486_v11  ;;  %v451_v31 = vld [vmem:[%s2475_s0 + $0x140] sm:$0xff]  ;;  %v460_v33 = vld [vmem:[%s2475_s0 + $0x188] sm:$0xff]  ;;  %v488_v35 = vpack.c.bf16 %v438_v29, %v437_v28  ;;  %v417_v38 = vld [vmem:[%s2475_s0 + $0x30] sm:$0xff] }
  0x1a   : > { %1563 = vmatmul.msk.bf16.vlgmr.msra.gmra.mxu2 %vm527_vm0, %v493_v12  ;;  %1567 = vmatmul.msk.bf16.vlgmr.msra.gmra.mxu3 %vm527_vm0, %v497_v13  ;;  %v495_v36 = vpack.c.bf16 %v452_v32, %v451_v31  ;;  %v499_v37 = vpack.c.bf16 %v460_v33, %v459_v30  ;;  %v418_v39 = vld [vmem:[%s2475_s0 + $0x38] sm:$0xff]  ;;  %v439_v40 = vld [vmem:[%s2475_s0 + $0xe0] sm:$0xff]  ;;  %v440_v41 = vld [vmem:[%s2475_s0 + $0xe8] sm:$0xff] }
  0x1b   : > { %v461_v42 = vld [vmem:[%s2475_s0 + $0x190] sm:$0xff]  ;;  %v454_v44 = vld [vmem:[%s2475_s0 + $0x158] sm:$0xff]  ;;  %v478_v46 = vpack.c.bf16 %v418_v39, %v417_v38  ;;  %v489_v47 = vpack.c.bf16 %v440_v41, %v439_v40  ;;  %v419_v50 = vld [vmem:[%s2475_s0 + $0x40] sm:$0xff] }
  0x1c   : > { %v453_v43 = vld [vmem:[%s2475_s0 + $0x150] sm:$0xff]  ;;  %v462_v45 = vld [vmem:[%s2475_s0 + $0x198] sm:$0xff]  ;;  %v420_v51 = vld [vmem:[%s2475_s0 + $0x48] sm:$0xff] }
  0x1d   : > { %v496_v48 = vpack.c.bf16 %v454_v44, %v453_v43  ;;  %v500_v49 = vpack.c.bf16 %v462_v45, %v461_v42  ;;  %v441_v52 = vld [vmem:[%s2475_s0 + $0xf0] sm:$0xff]  ;;  %v442_v53 = vld [vmem:[%s2475_s0 + $0xf8] sm:$0xff]  ;;  %v463_v54 = vld [vmem:[%s2475_s0 + $0x1a0] sm:$0xff]  ;;  %v479_v56 = vpack.c.bf16 %v420_v51, %v419_v50 }
  0x1e   : > { %v464_v55 = vld [vmem:[%s2475_s0 + $0x1a8] sm:$0xff]  ;;  %v490_v57 = vpack.c.bf16 %v442_v53, %v441_v52  ;;  %v421_v59 = vld [vmem:[%s2475_s0 + $0x50] sm:$0xff]  ;;  %v422_v60 = vld [vmem:[%s2475_s0 + $0x58] sm:$0xff] }
  0x1f   : > { %v501_v58 = vpack.c.bf16 %v464_v55, %v463_v54  ;;  %v465_v61 = vld [vmem:[%s2475_s0 + $0x1b0] sm:$0xff]  ;;  %v466_v62 = vld [vmem:[%s2475_s0 + $0x1b8] sm:$0xff]  ;;  %v480_v63 = vpack.c.bf16 %v422_v60, %v421_v59  ;;  %v443_v1 = vld [vmem:[%s2475_s0 + $0x100] sm:$0xff] }
  0x20   : > { %v502_v0 = vpack.c.bf16 %v466_v62, %v465_v61  ;;  %v444_v2 = vld [vmem:[%s2475_s0 + $0x108] sm:$0xff]  ;;  %v423_v4 = vld [vmem:[%s2475_s0 + $0x60] sm:$0xff]  ;;  %v445_v10 = vld [vmem:[%s2475_s0 + $0x110] sm:$0xff] }
  0x21   : > { %v491_v3 = vpack.c.bf16 %v444_v2, %v443_v1  ;;  %v424_v5 = vld [vmem:[%s2475_s0 + $0x68] sm:$0xff]  ;;  %v467_v6 = vld [vmem:[%s2475_s0 + $0x1c0] sm:$0xff]  ;;  %v446_v11 = vld [vmem:[%s2475_s0 + $0x118] sm:$0xff] }
  0x22   : > { %v468_v7 = vld [vmem:[%s2475_s0 + $0x1c8] sm:$0xff]  ;;  %v481_v8 = vpack.c.bf16 %v424_v5, %v423_v4  ;;  %v492_v12 = vpack.c.bf16 %v446_v11, %v445_v10  ;;  %v425_v13 = vld [vmem:[%s2475_s0 + $0x70] sm:$0xff]  ;;  %v426_v14 = vld [vmem:[%s2475_s0 + $0x78] sm:$0xff] }
  0x23   : > { %v503_v9 = vpack.c.bf16 %v468_v7, %v467_v6  ;;  %v469_v15 = vld [vmem:[%s2475_s0 + $0x1d0] sm:$0xff]  ;;  %v470_v16 = vld [vmem:[%s2475_s0 + $0x1d8] sm:$0xff]  ;;  %v482_v17 = vpack.c.bf16 %v426_v14, %v425_v13  ;;  %v427_v19 = vld [vmem:[%s2475_s0 + $0x80] sm:$0xff] }
  0x24   : > { %v504_v18 = vpack.c.bf16 %v470_v16, %v469_v15  ;;  %v428_v20 = vld [vmem:[%s2475_s0 + $0x88] sm:$0xff]  ;;  %v471_v21 = vld [vmem:[%s2475_s0 + $0x1e0] sm:$0xff]  ;;  %v429_v31 = vld [vmem:[%s2475_s0 + $0x90] sm:$0xff] }
  0x25   : > { %v430_v32 = vld [vmem:[%s2475_s0 + $0x98] sm:$0xff]  ;;  %v473_v33 = vld [vmem:[%s2475_s0 + $0x1f0] sm:$0xff]  ;;  %v431_v45 = vld [vmem:[%s2475_s0 + $0xa0] sm:$0xff] }
  0x29   : > { %1546 = vmatmul.msk.bf16.gmra.mxu0 %vm527_vm0, %v476_v22  ;;  %1557 = vmatmul.msk.bf16.gmra.mxu1 %vm527_vm0, %v487_v23  ;;  %v472_v22 = vld [vmem:[%s2475_s0 + $0x1e8] sm:$0xff]  ;;  %v483_v23 = vpack.c.bf16 %v428_v20, %v427_v19 }
  0x2a   : > { %1564 = vmatmul.msk.bf16.gmra.mxu2 %vm527_vm0, %v494_v24  ;;  %1568 = vmatmul.msk.bf16.gmra.mxu3 %vm527_vm0, %v498_v25  ;;  %v505_v26 = vpack.c.bf16 %v472_v22, %v471_v21 }
  0x39   : > { %1547 = vmatmul.msk.bf16.gmra.mxu0 %vm527_vm0, %v477_v34  ;;  %1558 = vmatmul.msk.bf16.gmra.mxu1 %vm527_vm0, %v488_v35  ;;  %v474_v34 = vld [vmem:[%s2475_s0 + $0x1f8] sm:$0xff] }
  0x3a   : > { %1565 = vmatmul.msk.bf16.gmra.mxu2 %vm527_vm0, %v495_v36  ;;  %1569 = vmatmul.msk.bf16.gmra.mxu3 %vm527_vm0, %v499_v37  ;;  %v484_v37 = vpack.c.bf16 %v430_v32, %v429_v31  ;;  %v506_v40 = vpack.c.bf16 %v474_v34, %v473_v33 }
  0x49   : > { %1548 = vmatmul.msk.bf16.gmra.mxu0 %vm527_vm0, %v478_v46  ;;  %1559 = vmatmul.msk.bf16.gmra.mxu1 %vm527_vm0, %v489_v47  ;;  %v432_v46 = vld [vmem:[%s2475_s0 + $0xa8] sm:$0xff]  ;;  %v2179_v47 = vld [vmem:[%s2477_s2] ss:$0 sm:$0xff] }
  0x4a   : > { %1566 = vmatmul.msk.bf16.gmra.mxu2 %vm527_vm0, %v496_v48  ;;  %1570 = vmatmul.msk.bf16.gmra.mxu3 %vm527_vm0, %v500_v49  ;;  %v485_v50 = vpack.c.bf16 %v432_v46, %v431_v45 }
  0x59   : > { %1549 = vmatmul.msk.bf16.gmra.mxu0 %vm527_vm0, %v479_v56  ;;  %1560 = vmatmul.msk.bf16.gmra.mxu1 %vm527_vm0, %v490_v57 }
  0x5a   : > { %1571 = vmatmul.msk.bf16.gmra.mxu3 %vm527_vm0, %v501_v58 }
  0x69   : > { %1550 = vmatmul.msk.bf16.gmra.mxu0 %vm527_vm0, %v480_v63  ;;  %1561 = vmatmul.msk.bf16.gmra.mxu1 %vm527_vm0, %v491_v3 }
  0x6a   : > { %1572 = vmatmul.msk.bf16.gmra.mxu3 %vm527_vm0, %v502_v0 }
  0x79   : > { %1551 = vmatmul.msk.bf16.gmra.mxu0 %vm527_vm0, %v481_v8  ;;  %1562 = vmatmul.msk.bf16.gmra.mxu1 %vm527_vm0, %v492_v12 }
  0x7a   : > { %1573 = vmatmul.msk.bf16.gmra.mxu3 %vm527_vm0, %v503_v9 }
  0x89   : > { %1552 = vmatmul.msk.bf16.gmra.mxu0 %vm527_vm0, %v482_v17 }
  0x8a   : > { %1574 = vmatmul.msk.bf16.gmra.mxu3 %vm527_vm0, %v504_v18 }
  0x96   : > { %v2134_v24 = vpop.f32.mrf.mxu0  ;;  %v2136_v25 = vpop.f32.mrf.mxu1 }
  0x99   : > { %1553 = vmatmul.msk.bf16.gmra.mxu0 %vm527_vm0, %v483_v23 }
  0x9a   : > { %1575 = vmatmul.msk.bf16.gmra.mxu3 %vm527_vm0, %v505_v26 }
  0x9d   : > { %v2140_v27 = vpop.f32.mrf.mxu2  ;;  %v743_v28 = vpop.f32.mrf.mxu3 }
  0x9e   : > { %v2142_v29 = vpop.f32.mrf.mxu0  ;;  %v2144_v30 = vpop.f32.mrf.mxu1  ;;  %v744_v57 = vadd.f32 %v2179_v47, %v743_v28 }
  0xa0   : > { %v837_v62 = vmax.f32 %v744_v57, 0.0 }
  0xa5   : > { %v2158_v35 = vpop.f32.mrf.mxu2  ;;  %v745_v36 = vpop.f32.mrf.mxu3 }
  0xa6   : > { %v2160_v38 = vpop.f32.mrf.mxu0  ;;  %v2162_v39 = vpop.f32.mrf.mxu1  ;;  %v746_v55 = vadd.f32 %v2179_v47, %v745_v36  ;;  %v726_v28 = vadd.f32 %v2179_v47, %v2158_v35 }
  0xa7   : > { %v694_v57 = vadd.f32 %v2179_v47, %v2162_v39 }
  0xa8   : > { %v838_v59 = vmax.f32 %v746_v55, 0.0  ;;  %v830_v46 = vmax.f32 %v726_v28, 0.0 }
  0xa9   : > { %1554 = vmatmul.msk.bf16.gmra.mxu0 %vm527_vm0, %v484_v37  ;;  %v724_v37 = vadd.f32 %v2179_v47, %v2140_v27 }
  0xaa   : > { %1576 = vmatmul.msk.bf16.gmra.mxu3 %vm527_vm0, %v506_v40 }
  0xad   : > { %v728_v41 = vpop.f32.mrf.mxu2  ;;  %v748_v42 = vpop.f32.mrf.mxu3 }
  0xae   : > { %v2166_v43 = vpop.f32.mrf.mxu0  ;;  %v2168_v44 = vpop.f32.mrf.mxu1  ;;  %v749_v51 = vadd.f32 %v2179_v47, %v748_v42  ;;  %v729_v21 = vadd.f32 %v2179_v47, %v728_v41 }
  0xaf   : > { %v696_v55 = vadd.f32 %v2179_v47, %v2168_v44  ;;  %v689_v44 = vadd.f32 %v2179_v47, %v2136_v25 }
  0xb0   : > { %v839_v58 = vmax.f32 %v749_v51, 0.0  ;;  %v831_v40 = vmax.f32 %v729_v21, 0.0 }
  0xb1   : > { %v815_v39 = vmax.f32 %v689_v44, 0.0 }
  0xb5   : > { %v730_v48 = vpop.f32.mrf.mxu2  ;;  %v750_v49 = vpop.f32.mrf.mxu3 }
  0xb6   : > { %v751_v52 = vadd.f32 %v2179_v47, %v750_v49  ;;  %v2183_v53 = vpop.f32.mrf.mxu0  ;;  %v698_v54 = vpop.f32.mrf.mxu1  ;;  %v731_v19 = vadd.f32 %v2179_v47, %v730_v48  ;;  %v829_v49 = vmax.f32 %v724_v37, 0.0 }
  0xb8   : > { %v840_v56 = vmax.f32 %v751_v52, 0.0  ;;  %v832_v31 = vmax.f32 %v731_v19, 0.0 }
  0xb9   : > { %1555 = vmatmul.msk.bf16.gmra.mxu0 %vm527_vm0, %v485_v50  ;;  %v699_v50 = vadd.f32 %v2179_v47, %v698_v54  ;;  %v691_v54 = vadd.f32 %v2179_v47, %v2144_v30 }
  0xba   : > { %908 = vmatpush.msrb.mxu3 %v840_v56 }
  0xbc   : > { %909 = vmatpush.msrb.mxu3 %v839_v58  ;;  %v819_v58 = vmax.f32 %v699_v50, 0.0 }
  0xbd   : > { %v733_v60 = vpop.f32.mrf.mxu2  ;;  %v2188_v61 = vpop.f32.mrf.mxu3 }
  0xbe   : > { %v2190_v63 = vpop.f32.mrf.mxu0  ;;  %v700_v0 = vpop.f32.mrf.mxu1  ;;  %910 = vmatpush.msrb.mxu3 %v838_v59  ;;  %v734_v16 = vadd.f32 %v2179_v47, %v733_v60  ;;  %v818_v59 = vmax.f32 %v696_v55, 0.0  ;;  %v817_v60 = vmax.f32 %v694_v57, 0.0 }
  0xbf   : > { %v701_v35 = vadd.f32 %v2179_v47, %v700_v0 }
  0xc0   : > { %911 = vmatpush.msrb.mxu3 %v837_v62  ;;  %v833_v22 = vmax.f32 %v734_v16, 0.0 }
  0xc1   : > { %v820_v56 = vmax.f32 %v701_v35, 0.0 }
  0xc5   : > { %v735_v1 = vpop.f32.mrf.mxu2  ;;  %v2192_v2 = vpop.f32.mrf.mxu3 }
  0xc6   : > { %v2194_v3 = vpop.f32.mrf.mxu0  ;;  %v703_v4 = vpop.f32.mrf.mxu1  ;;  %v736_v12 = vadd.f32 %v2179_v47, %v735_v1 }
  0xc7   : > { %v704_v41 = vadd.f32 %v2179_v47, %v703_v4  ;;  %v816_v4 = vmax.f32 %v691_v54, 0.0 }
  0xc8   : > { %v834_v20 = vmax.f32 %v736_v12, 0.0 }
  0xc9   : > { %v821_v51 = vmax.f32 %v704_v41, 0.0 }
  0xcd   : > { %v738_v5 = vpop.f32.mrf.mxu2  ;;  %v2196_v6 = vpop.f32.mrf.mxu3 }
  0xce   : > { %v2198_v7 = vpop.f32.mrf.mxu0  ;;  %v705_v8 = vpop.f32.mrf.mxu1  ;;  %v739_v9 = vadd.f32 %v2179_v47, %v738_v5 }
  0xcf   : > { %v706_v34 = vadd.f32 %v2179_v47, %v705_v8  ;;  %v651_v57 = vadd.f32 %v2179_v47, %v2198_v7  ;;  %v641_v7 = vadd.f32 %v2179_v47, %v2166_v43  ;;  %v634_v43 = vadd.f32 %v2179_v47, %v2134_v24 }
  0xd0   : > { %v835_v17 = vmax.f32 %v739_v9, 0.0 }
  0xd1   : > { %v822_v48 = vmax.f32 %v706_v34, 0.0 }
  0xd5   : > { %v740_v10 = vpop.f32.mrf.mxu2  ;;  %v2201_v11 = vpop.f32.mrf.mxu3 }
  0xd6   : > { %v741_v13 = vadd.f32 %v2179_v47, %v740_v10  ;;  %v2205_v14 = vpop.f32.mrf.mxu0  ;;  %v708_v15 = vpop.f32.mrf.mxu1 }
  0xd7   : > { %v709_v23 = vadd.f32 %v2179_v47, %v708_v15  ;;  %v654_v55 = vadd.f32 %v2179_v47, %v2205_v14  ;;  %v644_v14 = vadd.f32 %v2179_v47, %v2183_v53  ;;  %v636_v53 = vadd.f32 %v2179_v47, %v2142_v29 }
  0xd8   : > { %v836_v18 = vmax.f32 %v741_v13, 0.0 }
  0xd9   : > { %v823_v42 = vmax.f32 %v709_v23, 0.0 }
  0xda   : > { %912 = vmatpush.msrb.mxu3 %v836_v18 }
  0xdc   : > { %913 = vmatpush.msrb.mxu3 %v835_v17 }
  0xdd   : > { %v2211_v26 = vpop.f32.mrf.mxu3 }
  0xde   : > { %914 = vmatpush.msrb.mxu3 %v834_v20  ;;  %v2215_v32 = vpop.f32.mrf.mxu0  ;;  %v710_v33 = vpop.f32.mrf.mxu1 }
  0xdf   : > { %v711_v36 = vadd.f32 %v2179_v47, %v710_v33  ;;  %v656_v50 = vadd.f32 %v2179_v47, %v2215_v32  ;;  %v646_v32 = vadd.f32 %v2179_v47, %v2190_v63  ;;  %v639_v63 = vadd.f32 %v2179_v47, %v2160_v38 }
  0xe0   : > { %915 = vmatpush.msrb.mxu3 %v833_v22 }
  0xe1   : > { %v824_v45 = vmax.f32 %v711_v36, 0.0 }
  0xe2   : > { %916 = vmatpush.msrb.mxu3 %v832_v31 }
  0xe3   : > { %888 = vmatpush.msrb.mxu2 %v824_v45 }
  0xe4   : > { %917 = vmatpush.msrb.mxu3 %v831_v40 }
  0xe5   : > { %v2224_v52 = vpop.f32.mrf.mxu3  ;;  %889 = vmatpush.msrb.mxu2 %v823_v42 }
  0xe6   : > { %918 = vmatpush.msrb.mxu3 %v830_v46  ;;  %v658_v27 = vpop.f32.mrf.mxu0  ;;  %v713_v1 = vpop.f32.mrf.mxu1 }
  0xe7   : > { %890 = vmatpush.msrb.mxu2 %v822_v48  ;;  %v714_v18 = vadd.f32 %v2179_v47, %v713_v1  ;;  %v659_v48 = vadd.f32 %v2179_v47, %v658_v27  ;;  %v649_v27 = vadd.f32 %v2179_v47, %v2194_v3  ;;  %v798_v1 = vmax.f32 %v646_v32, 0.0  ;;  %v857_v3 = vld [vmem:[%s2478_s3] sm:$0xff] }
  0xe8   : > { %919 = vmatpush.msrb.mxu3 %v829_v49  ;;  %859 = vst [vmem:[#allocation1] ss:$4 sm:$0xff] %v857_v3 }
  0xe9   : > { %891 = vmatpush.msrb.mxu2 %v821_v51  ;;  %v825_v31 = vmax.f32 %v714_v18, 0.0  ;;  %v799_v44 = vmax.f32 %v649_v27, 0.0 }
  0xeb   : > { %892 = vmatpush.msrb.mxu2 %v820_v56  ;;  %v803_v56 = vmax.f32 %v659_v48, 0.0 }
  0xed   : > { %v2232_v62 = vpop.f32.mrf.mxu3  ;;  %893 = vmatpush.msrb.mxu2 %v819_v58  ;;  %v802_v58 = vmax.f32 %v656_v50, 0.0 }
  0xee   : > { %v660_v0 = vpop.f32.mrf.mxu0  ;;  %v715_v9 = vpop.f32.mrf.mxu1 }
  0xef   : > { %894 = vmatpush.msrb.mxu2 %v818_v59  ;;  %v716_v17 = vadd.f32 %v2179_v47, %v715_v9  ;;  %v661_v42 = vadd.f32 %v2179_v47, %v660_v0  ;;  %v800_v0 = vmax.f32 %v651_v57, 0.0  ;;  %v796_v9 = vmax.f32 %v641_v7, 0.0  ;;  %v860_v38 = vld.sshfl [vmem:[#allocation1] sm:$0xff pattern:$0x73625140] }
  0xf0   : > { %v759_v7 = vadd.f32 %v2179_v47, %v2196_v6  ;;  %v1751_v6 = vld [vmem:[%s2479_s4 + $0x28] sm:$0xff] }
  0xf1   : > { %895 = vmatpush.msrb.mxu2 %v817_v60  ;;  %v826_v21 = vmax.f32 %v716_v17, 0.0  ;;  %v804_v51 = vmax.f32 %v661_v42, 0.0  ;;  %v801_v60 = vmax.f32 %v654_v55, 0.0  ;;  %v862_v17 = vld.sshfl [vmem:[#allocation1 + $0x10] sm:$0xff pattern:$0x73625140] }
  0xf2   : > { %v843_v3 = vmax.f32 %v759_v7, 0.0 }
  0xf3   : > { %896 = vmatpush.msrb.mxu2 %v816_v4 }
  0xf5   : > { %v2236_v5 = vpop.f32.mrf.mxu3  ;;  %897 = vmatpush.msrb.mxu2 %v815_v39 }
  0xf6   : > { %v663_v8 = vpop.f32.mrf.mxu0  ;;  %v718_v12 = vpop.f32.mrf.mxu1  ;;  %v771_v55 = vadd.f32 %v2179_v47, %v2236_v5  ;;  %v766_v5 = vadd.f32 %v2179_v47, %v2224_v52 }
  0xf7   : > { %v719_v19 = vadd.f32 %v2179_v47, %v718_v12  ;;  %v664_v40 = vadd.f32 %v2179_v47, %v663_v8  ;;  %v797_v8 = vmax.f32 %v644_v14, 0.0  ;;  %v794_v12 = vmax.f32 %v636_v53, 0.0  ;;  %v861_v14 = vld.sshfl [vmem:[#allocation1 + $0x8] sm:$0xff pattern:$0x73625140] }
  0xf8   : > { %v846_v52 = vmax.f32 %v766_v5, 0.0  ;;  %v863_v53 = vld.sshfl [vmem:[#allocation1 + $0x18] sm:$0xff pattern:$0x73625140] }
  0xf9   : > { %v827_v22 = vmax.f32 %v719_v19, 0.0  ;;  %v805_v49 = vmax.f32 %v664_v40, 0.0 }
  0xfd   : > { %v2238_v30 = vpop.f32.mrf.mxu3 }
  0xfe   : > { %v665_v10 = vpop.f32.mrf.mxu0  ;;  %v720_v16 = vpop.f32.mrf.mxu1 }
  0xff   : > { %v721_v25 = vadd.f32 %v2179_v47, %v720_v16  ;;  %v666_v36 = vadd.f32 %v2179_v47, %v665_v10  ;;  %v795_v10 = vmax.f32 %v639_v63, 0.0 }
 0x101   : > { %v828_v20 = vmax.f32 %v721_v25, 0.0  ;;  %v806_v45 = vmax.f32 %v666_v36, 0.0  ;;  %v793_v25 = vmax.f32 %v634_v43, 0.0  ;;  %v1746_v43 = vld [vmem:[%s2479_s4] sm:$0xff] }
 0x103   : > { %920 = vmatpush.msrb.mxu3 %v828_v20 }
 0x105   : > { %v2240_v13 = vpop.f32.mrf.mxu3  ;;  %921 = vmatpush.msrb.mxu3 %v827_v22 }
 0x106   : > { %v668_v15 = vpop.f32.mrf.mxu0  ;;  %v776_v42 = vadd.f32 %v2179_v47, %v2240_v13 }
 0x107   : > { %v669_v33 = vadd.f32 %v2179_v47, %v668_v15  ;;  %922 = vmatpush.msrb.mxu3 %v826_v21 }
 0x109   : > { %923 = vmatpush.msrb.mxu3 %v825_v31  ;;  %v807_v41 = vmax.f32 %v669_v33, 0.0 }
 0x10a   : > { %924 = vmatmul.f32.vlgmr.msrb.gmra.mxu3 %v862_v17 }
 0x10d   : > { %v2246_v23 = vpop.f32.mrf.mxu3 }
 0x10e   : > { %v670_v28 = vpop.f32.mrf.mxu0 }
 0x10f   : > { %v671_v34 = vadd.f32 %v2179_v47, %v670_v28 }
 0x111   : > { %v808_v37 = vmax.f32 %v671_v34, 0.0  ;;  %v779_v34 = vadd.f32 %v2179_v47, %v2246_v23 }
 0x113   : > { %868 = vmatpush.msrb.mxu1 %v808_v37  ;;  %v851_v50 = vmax.f32 %v779_v34, 0.0 }
 0x115   : > { %v780_v46 = vpop.f32.mrf.mxu3  ;;  %869 = vmatpush.msrb.mxu1 %v807_v41 }
 0x116   : > { %v2253_v35 = vpop.f32.mrf.mxu0  ;;  %v781_v31 = vadd.f32 %v2179_v47, %v780_v46 }
 0x117   : > { %870 = vmatpush.msrb.mxu1 %v806_v45 }
 0x118   : > { %v852_v45 = vmax.f32 %v781_v31, 0.0 }
 0x119   : > { %871 = vmatpush.msrb.mxu1 %v805_v49  ;;  %v774_v49 = vadd.f32 %v2179_v47, %v2238_v30 }
 0x11b   : > { %872 = vmatpush.msrb.mxu1 %v804_v51  ;;  %v849_v30 = vmax.f32 %v774_v49, 0.0 }
 0x11d   : > { %v783_v59 = vpop.f32.mrf.mxu3  ;;  %873 = vmatpush.msrb.mxu1 %v803_v56  ;;  %v850_v56 = vmax.f32 %v776_v42, 0.0 }
 0x11e   : > { %v2262_v54 = vpop.f32.mrf.mxu0  ;;  %v784_v22 = vadd.f32 %v2179_v47, %v783_v59  ;;  %v674_v59 = vadd.f32 %v2179_v47, %v2253_v35  ;;  %v1753_v35 = vld [vmem:[%s2479_s4 + $0x38] sm:$0xff] }
 0x11f   : > { %874 = vmatpush.msrb.mxu1 %v802_v58  ;;  %v676_v13 = vadd.f32 %v2179_v47, %v2262_v54  ;;  %v769_v58 = vadd.f32 %v2179_v47, %v2232_v62  ;;  %v764_v54 = vadd.f32 %v2179_v47, %v2211_v26  ;;  %v1752_v26 = vld [vmem:[%s2479_s4 + $0x30] sm:$0xff] }
 0x120   : > { %v853_v36 = vmax.f32 %v784_v22, 0.0  ;;  %v809_v62 = vmax.f32 %v674_v59, 0.0  ;;  %v1032_v22 = vld [vmem:[%s2481_s6 + $0x8] sm:$0xff] }
 0x121   : > { %875 = vmatpush.msrb.mxu1 %v801_v60  ;;  %v848_v60 = vmax.f32 %v771_v55, 0.0  ;;  %v810_v32 = vmax.f32 %v676_v13, 0.0 }
 0x123   : > { %876 = vmatpush.msrb.mxu1 %v800_v0  ;;  %v847_v0 = vmax.f32 %v769_v58, 0.0 }
 0x125   : > { %v785_v4 = vpop.f32.mrf.mxu3  ;;  %877 = vmatpush.msrb.mxu1 %v799_v44  ;;  %v761_v44 = vadd.f32 %v2179_v47, %v2201_v11  ;;  %v754_v11 = vadd.f32 %v2179_v47, %v2188_v61  ;;  %v1748_v61 = vld [vmem:[%s2479_s4 + $0x10] sm:$0xff] }
 0x126   : > { %v678_v39 = vpop.f32.mrf.mxu0  ;;  %v786_v24 = vadd.f32 %v2179_v47, %v785_v4  ;;  %v756_v4 = vadd.f32 %v2179_v47, %v2192_v2  ;;  %v1750_v2 = vld [vmem:[%s2479_s4 + $0x20] sm:$0xff] }
 0x127   : > { %878 = vmatpush.msrb.mxu1 %v798_v1  ;;  %v679_v23 = vadd.f32 %v2179_v47, %v678_v39  ;;  %v845_v1 = vmax.f32 %v764_v54, 0.0  ;;  %v844_v39 = vmax.f32 %v761_v44, 0.0 }
 0x128   : > { %v854_v33 = vmax.f32 %v786_v24, 0.0  ;;  %v842_v63 = vmax.f32 %v756_v4, 0.0 }
 0x129   : > { %879 = vmatpush.msrb.mxu1 %v797_v8  ;;  %v811_v27 = vmax.f32 %v679_v23, 0.0  ;;  %v841_v8 = vmax.f32 %v754_v11, 0.0 }
 0x12b   : > { %880 = vmatpush.msrb.mxu1 %v796_v9  ;;  %v1747_v9 = vld [vmem:[%s2479_s4 + $0x8] sm:$0xff] }
 0x12d   : > { %v788_v15 = vpop.f32.mrf.mxu3  ;;  %881 = vmatpush.msrb.mxu1 %v795_v10 }
 0x12e   : > { %v680_v16 = vpop.f32.mrf.mxu0  ;;  %v789_v29 = vadd.f32 %v2179_v47, %v788_v15 }
 0x12f   : > { %882 = vmatpush.msrb.mxu1 %v794_v12  ;;  %v681_v48 = vadd.f32 %v2179_v47, %v680_v16 }
 0x130   : > { %v855_v28 = vmax.f32 %v789_v29, 0.0  ;;  %v1810_v29 = vld [vmem:[%s2480_s5] ss:$0 sm:$0xff] }
 0x131   : > { %883 = vmatpush.msrb.mxu1 %v793_v25  ;;  %v812_v57 = vmax.f32 %v681_v48, 0.0 }
 0x132   : > { %884 = vmatmul.f32.vlgmr.msrb.gmra.mxu1 %v860_v38 }
 0x135   : > { %v790_v18 = vpop.f32.mrf.mxu3 }
 0x136   : > { %v791_v19 = vadd.f32 %v2179_v47, %v790_v18  ;;  %v683_v20 = vpop.f32.mrf.mxu0 }
 0x137   : > { %v684_v40 = vadd.f32 %v2179_v47, %v683_v20 }
 0x138   : > { %v856_v21 = vmax.f32 %v791_v19, 0.0 }
 0x139   : > { %v813_v51 = vmax.f32 %v684_v40, 0.0 }
 0x13a   : > { %928 = vmatpush.msra.mxu1 %v856_v21  ;;  %v1031_v21 = vld [vmem:[%s2481_s6] sm:$0xff] }
 0x13c   : > { %929 = vmatpush.msra.mxu1 %v855_v28 }
 0x13e   : > { %930 = vmatpush.msra.mxu1 %v854_v33  ;;  %v685_v37 = vpop.f32.mrf.mxu0 }
 0x13f   : > { %v686_v41 = vadd.f32 %v2179_v47, %v685_v37  ;;  %v1749_v47 = vld [vmem:[%s2479_s4 + $0x18] sm:$0xff] }
 0x140   : > { %931 = vmatpush.msra.mxu1 %v853_v36 }
 0x141   : > { %v814_v46 = vmax.f32 %v686_v41, 0.0 }
 0x142   : > { %932 = vmatpush.msra.mxu1 %v852_v45 }
 0x143   : > { %898 = vmatpush.msrb.mxu2 %v814_v46 }
 0x144   : > { %933 = vmatpush.msra.mxu1 %v851_v50 }
 0x145   : > { %899 = vmatpush.msrb.mxu2 %v813_v51 }
 0x146   : > { %934 = vmatpush.msra.mxu1 %v850_v56 }
 0x147   : > { %900 = vmatpush.msrb.mxu2 %v812_v57 }
 0x148   : > { %935 = vmatpush.msra.mxu1 %v849_v30 }
 0x149   : > { %901 = vmatpush.msrb.mxu2 %v811_v27 }
 0x14a   : > { %936 = vmatpush.msra.mxu1 %v848_v60 }
 0x14b   : > { %902 = vmatpush.msrb.mxu2 %v810_v32 }
 0x14c   : > { %937 = vmatpush.msra.mxu1 %v847_v0 }
 0x14d   : > { %903 = vmatpush.msrb.mxu2 %v809_v62 }
 0x14e   : > { %938 = vmatpush.msra.mxu1 %v846_v52  ;;  %904 = vmatmul.f32.vlgmr.msrb.gmra.mxu2 %v861_v14 }
 0x14f   : > { %1017 = vmatpush.bf16.msra.mxu2 %v1753_v35 }
 0x150   : > { %939 = vmatpush.msra.mxu1 %v845_v1 }
 0x152   : > { %940 = vmatpush.msra.mxu1 %v844_v39 }
 0x153   : > { %1018 = vmatpush.bf16.msra.mxu2 %v1752_v26 }
 0x154   : > { %941 = vmatpush.msra.mxu1 %v843_v3 }
 0x156   : > { %942 = vmatpush.msra.mxu1 %v842_v63 }
 0x157   : > { %1019 = vmatpush.bf16.msra.mxu2 %v1751_v6 }
 0x158   : > { %943 = vmatpush.msra.mxu1 %v841_v8 }
 0x159   : > { %944 = vmatmul.f32.vlgmr.msra.gmra.mxu1 %v863_v53 }
 0x15b   : > { %1020 = vmatpush.bf16.msra.mxu2 %v1750_v2 }
 0x15f   : > { %1021 = vmatpush.bf16.msra.mxu2 %v1749_v47 }
 0x163   : > { %1022 = vmatpush.bf16.msra.mxu2 %v1748_v61 }
 0x167   : > { %1023 = vmatpush.bf16.msra.mxu2 %v1747_v9 }
 0x16b   : > { %1024 = vmatpush.bf16.msra.mxu2 %v1746_v43 }
 0x18d   : > { %v925_v15 = vpop.f32.mrf.mxu3 }
 0x1af   : > { %v885_v10 = vpop.f32.mrf.mxu1 }
 0x1d1   : > { %v905_v12 = vpop.f32.mrf.mxu2 }
 0x1d2   : > { %v906_v16 = vadd.f32 %v905_v12, %v885_v10 }
 0x1d4   : > { %v926_v25 = vadd.f32 %v925_v15, %v906_v16 }
 0x1d6   : > { %v945_v38 = vpop.f32.mrf.mxu1 }
 0x1d7   : > { %v946_v17 = vadd.f32 %v945_v38, %v926_v25 }
 0x1d9   : > { %v948_v18 = vpack.c.bf16 %v946_v17, %v946_v17 }
 0x1db   : > { %1025 = vmatmul.bf16.vlgmr.msra.gmra.mxu2 %v948_v18 }
 0x25e   : > { %v1026_v19 = vpop.f32.mrf.mxu2 }
 0x25f   : > { %v1027_v20 = vadd.f32 %v1810_v29, %v1026_v19 }
 0x261   : > { %v1030_v24 = vmax.f32 %v1027_v20, 0.0 }
 0x263   : > { %v1033_v28 = vperm.slane %v1030_v24, 0  ;;  %v1038_v31 = vperm.slane %v1030_v24, 1 }
 0x265   : > { %v1034_v33 = vadd.f32 %v1033_v28, %v1031_v21  ;;  %v1035_v34 = vadd.f32 %v1033_v28, %v1032_v22  ;;  %v1039_v36 = vadd.f32 %v1038_v31, %v1031_v21  ;;  %v1040_v37 = vadd.f32 %v1038_v31, %v1032_v22 }
 0x266   : > { %v1028_v40 = vpop.f32.mrf.mxu2 }
 0x267   : > { %1036 = vst [vmem:[#allocation2 + $0x10] sm:$0xff] %v1034_v33 }
 0x268   : > { %1037 = vst [vmem:[#allocation2] sm:$0xff] %v1035_v34 }
 0x269   : > { %1041 = vst [vmem:[#allocation2 + $0x18] sm:$0xff] %v1039_v36 }
 0x26a   : > { %1042 = vst [vmem:[#allocation2 + $0x8] sm:$0xff] %v1040_v37 }
 0x26b PF: > { %v1775_v41 = vld [vmem:[%s1924_s30 + $0xac] sm:$0xf]  ;;  %v1697_v42 = vld [vmem:[%s1924_s30 + $0xb4] sm:$0xf0]  ;;  %v1772_v45 = vld [vmem:[%s1924_s30 + $0x94] sm:$0xf] }
 0x26c   : > { %v1700_v48 = vor.u32 %v1775_v41, %v1697_v42  ;;  %v1685_v46 = vld [vmem:[%s1924_s30 + $0x9c] sm:$0xf0]  ;;  %v1769_v50 = vld [vmem:[%s1924_s30 + $0x7c] sm:$0xf]  ;;  %v1673_v23 = vld [vmem:[%s1924_s30 + $0x84] sm:$0xf0] }
 0x26d   : > { %v1688_v49 = vor.u32 %v1772_v45, %v1685_v46  ;;  %v1695_v51 = vld [vmem:[%s1924_s30 + $0xa8] sm:$0xf]  ;;  %v1776_v55 = vld [vmem:[%s1924_s30 + $0xb0] sm:$0xf0]  ;;  %v1683_v13 = vld [vmem:[%s1924_s30 + $0x90] sm:$0xf]  ;;  %v1676_v58 = vor.u32 %v1769_v50, %v1673_v23 }
 0x26e   : > { %1228 = vmatpush.bf16.msra.mxu1 %v1700_v48  ;;  %v1696_v56 = vor.u32 %v1776_v55, %v1695_v51  ;;  %v1773_v57 = vld [vmem:[%s1924_s30 + $0x98] sm:$0xf0]  ;;  %v1766_v30 = vld [vmem:[%s1924_s30 + $0x64] sm:$0xf]  ;;  %v1661_v27 = vld [vmem:[%s1924_s30 + $0x6c] sm:$0xf0] }
 0x26f   : > { %v1684_v59 = vor.u32 %v1773_v57, %v1683_v13  ;;  %v1671_v5 = vld [vmem:[%s1924_s30 + $0x78] sm:$0xf]  ;;  %v1770_v60 = vld [vmem:[%s1924_s30 + $0x80] sm:$0xf0]  ;;  %v1664_v32 = vor.u32 %v1766_v30, %v1661_v27  ;;  %v1763_v54 = vld [vmem:[%s1924_s30 + $0x4c] sm:$0xf] }
 0x270   : > { %1209 = vmatpush.bf16.msra.mxu0 %v1696_v56  ;;  %v1672_v0 = vor.u32 %v1770_v60, %v1671_v5  ;;  %v1649_v62 = vld [vmem:[%s1924_s30 + $0x54] sm:$0xf0]  ;;  %v1659_v14 = vld [vmem:[%s1924_s30 + $0x60] sm:$0xf]  ;;  %v1767_v35 = vld [vmem:[%s1924_s30 + $0x68] sm:$0xf0] }
 0x271   : > { %v1652_v44 = vor.u32 %v1763_v54, %v1649_v62  ;;  %v1760_v52 = vld [vmem:[%s1924_s30 + $0x34] sm:$0xf]  ;;  %v1660_v7 = vor.u32 %v1767_v35, %v1659_v14  ;;  %v1637_v1 = vld [vmem:[%s1924_s30 + $0x3c] sm:$0xf0]  ;;  %v1647_v26 = vld [vmem:[%s1924_s30 + $0x48] sm:$0xf] }
 0x272   : > { %1229 = vmatpush.bf16.msra.mxu1 %v1688_v49  ;;  %v1764_v4 = vld [vmem:[%s1924_s30 + $0x50] sm:$0xf0]  ;;  %v1640_v39 = vor.u32 %v1760_v52, %v1637_v1  ;;  %v1757_v11 = vld [vmem:[%s1924_s30 + $0x1c] sm:$0xf]  ;;  %v1625_v6 = vld [vmem:[%s1924_s30 + $0x24] sm:$0xf0] }
 0x273   : > { %v1648_v3 = vor.u32 %v1764_v4, %v1647_v26  ;;  %v1635_v63 = vld [vmem:[%s1924_s30 + $0x30] sm:$0xf]  ;;  %v1761_v8 = vld [vmem:[%s1924_s30 + $0x38] sm:$0xf0]  ;;  %v1628_v53 = vor.u32 %v1757_v11, %v1625_v6  ;;  %v1754_v2 = vld [vmem:[%s1924_s30 + $0x4] sm:$0xf] }
 0x274   : > { %1210 = vmatpush.bf16.msra.mxu0 %v1684_v59  ;;  %v1636_v47 = vor.u32 %v1761_v8, %v1635_v63  ;;  %v1613_v61 = vld [vmem:[%s1924_s30 + $0xc] sm:$0xf0]  ;;  %v1623_v9 = vld [vmem:[%s1924_s30 + $0x18] sm:$0xf]  ;;  %v1758_v43 = vld [vmem:[%s1924_s30 + $0x20] sm:$0xf0] }
 0x275   : > { %v1616_v10 = vor.u32 %v1754_v2, %v1613_v61  ;;  %v2379_v12 = vld [vmem:[#allocation2 + $0x10] sm:$0xff]  ;;  %v2381_v15 = vld [vmem:[#allocation2] sm:$0xff]  ;;  %v1624_v16 = vor.u32 %v1758_v43, %v1623_v9  ;;  %v1611_v25 = vld [vmem:[%s1924_s30] sm:$0xf]  ;;  %vm1293_vm1 = vcmask 261120   ;;  %p1739_p5 = scmp.eq.s32.totalorder %s1902_s18, 3 }
 0x276   : > { %1230 = vmatpush.bf16.msra.mxu1 %v1676_v58  ;;  %v1755_v38 = vld [vmem:[%s1924_s30 + $0x8] sm:$0xf0]  ;;  %v2387_v17 = vpack.c.bf16 %v2381_v15, %v2379_v12  ;;  %v2391_v29 = vld [vmem:[#allocation2 + $0x18] sm:$0xff]  ;;  %v2393_v19 = vld [vmem:[#allocation2 + $0x8] sm:$0xff] }
 0x277   : > { %v1612_v18 = vor.u32 %v1755_v38, %v1611_v25  ;;  %v2397_v20 = vpack.c.bf16 %v2393_v19, %v2391_v29  ;;  %v1703_v45 = vld [vmem:[%s1924_s30 + $0xb0] sm:$0xf]  ;;  %v1777_v48 = vld [vmem:[%s1924_s30 + $0xb8] sm:$0xf0]  ;;  %v1691_v49 = vld [vmem:[%s1924_s30 + $0x98] sm:$0xf] }
 0x278   : > { %1211 = vmatpush.bf16.msra.mxu0 %v1672_v0  ;;  %v1704_v46 = vor.u32 %v1777_v48, %v1703_v45  ;;  %v1774_v50 = vld [vmem:[%s1924_s30 + $0xa0] sm:$0xf0]  ;;  %v1679_v51 = vld [vmem:[%s1924_s30 + $0x80] sm:$0xf]  ;;  %v1771_v55 = vld [vmem:[%s1924_s30 + $0x88] sm:$0xf0] }
 0x279   : > { %v1692_v23 = vor.u32 %v1774_v50, %v1691_v49  ;;  %v1680_v56 = vor.u32 %v1771_v55, %v1679_v51  ;;  %v1667_v13 = vld [vmem:[%s1924_s30 + $0x68] sm:$0xf]  ;;  %v1768_v57 = vld [vmem:[%s1924_s30 + $0x70] sm:$0xf0]  ;;  %v1655_v30 = vld [vmem:[%s1924_s30 + $0x50] sm:$0xf] }
 0x27a   : > { %1231 = vmatpush.bf16.msra.mxu1 %v1664_v32  ;;  %1247 = vmatpush.bf16.msra.mxu2 %v1704_v46  ;;  %v1668_v58 = vor.u32 %v1768_v57, %v1667_v13  ;;  %v1765_v59 = vld [vmem:[%s1924_s30 + $0x58] sm:$0xf0]  ;;  %v1270_v27 = vld [vmem:[%s2482_s7] sm:$0xff]  ;;  %v1643_v54 = vld [vmem:[%s1924_s30 + $0x38] sm:$0xf] }
 0x27b   : > { %v1656_v60 = vor.u32 %v1765_v59, %v1655_v30  ;;  %v1762_v0 = vld [vmem:[%s1924_s30 + $0x40] sm:$0xf0]  ;;  %v1631_v35 = vld [vmem:[%s1924_s30 + $0x20] sm:$0xf]  ;;  %v1271_v52 = vld [vmem:[%s2482_s7 + $0x8] sm:$0xff] }
 0x27c   : > { %1212 = vmatpush.bf16.msra.mxu0 %v1660_v7  ;;  %v1644_v14 = vor.u32 %v1762_v0, %v1643_v54  ;;  %v1619_v4 = vld [vmem:[%s1924_s30 + $0x8] sm:$0xf]  ;;  %v1272_v6 = vld [vmem:[%s2482_s7 + $0x10] sm:$0xff]  ;;  %v1273_v2 = vld [vmem:[%s2482_s7 + $0x18] sm:$0xff] }
 0x27d   : > { %v1785_v55 = vld [vmem:[%s1915_s24 + $0x38] sm:$0xff]  ;;  %v1783_v57 = vld [vmem:[%s1915_s24 + $0x28] sm:$0xff]  ;;  %v1782_v30 = vld [vmem:[%s1915_s24 + $0x20] sm:$0xff] }
 0x27e   : > { %1232 = vmatpush.bf16.msra.mxu1 %v1652_v44  ;;  %1248 = vmatpush.bf16.msra.mxu2 %v1692_v23  ;;  %v1759_v44 = vld [vmem:[%s1924_s30 + $0x28] sm:$0xf0] }
 0x27f   : > { %v1632_v1 = vor.u32 %v1759_v44, %v1631_v35 }
 0x280   : > { %1213 = vmatpush.bf16.msra.mxu0 %v1648_v3 }
 0x282   : > { %1233 = vmatpush.bf16.msra.mxu1 %v1640_v39  ;;  %1249 = vmatpush.bf16.msra.mxu2 %v1680_v56  ;;  %v1756_v39 = vld [vmem:[%s1924_s30 + $0x10] sm:$0xf0] }
 0x283   : > { %v1620_v3 = vor.u32 %v1756_v39, %v1619_v4  ;;  %v1784_v56 = vld [vmem:[%s1915_s24 + $0x30] sm:$0xff] }
 0x284   : > { %1214 = vmatpush.bf16.msra.mxu0 %v1636_v47 }
 0x286   : > { %1234 = vmatpush.bf16.msra.mxu1 %v1628_v53  ;;  %1250 = vmatpush.bf16.msra.mxu2 %v1668_v58 }
 0x288   : > { %1215 = vmatpush.bf16.msra.mxu0 %v1624_v16 }
 0x28a   : > { %1235 = vmatpush.bf16.msra.mxu1 %v1616_v10  ;;  %1251 = vmatpush.bf16.msra.mxu2 %v1656_v60 }
 0x28c   : > { %1216 = vmatpush.bf16.msra.mxu0 %v1612_v18 }
 0x28d   : > { %1236 = vmatmul.bf16.vlgmr.msra.gmra.mxu1 %v2387_v17 }
 0x28e   : > { %1252 = vmatpush.bf16.msra.mxu2 %v1644_v14  ;;  %1792 = vmatpush.bf16.msrb.mxu1 %v1785_v55 }
 0x28f   : > { %1217 = vmatmul.bf16.vlgmr.msra.gmra.mxu0 %v2387_v17 }
 0x290   : > { %1441 = vmatpush.bf16.msrb.mxu0 %v1785_v55 }
 0x292   : > { %1253 = vmatpush.bf16.msra.mxu2 %v1632_v1  ;;  %1793 = vmatpush.bf16.msrb.mxu1 %v1784_v56  ;;  %v1779_v1 = vld [vmem:[%s1915_s24 + $0x8] sm:$0xff] }
 0x294   : > { %1442 = vmatpush.bf16.msrb.mxu0 %v1784_v56 }
 0x296   : > { %1254 = vmatpush.bf16.msra.mxu2 %v1620_v3  ;;  %1794 = vmatpush.bf16.msrb.mxu1 %v1783_v57 }
 0x298   : > { %1443 = vmatpush.bf16.msrb.mxu0 %v1783_v57 }
 0x299   : > { %1255 = vmatmul.bf16.vlgmr.msra.gmra.mxu2 %v2387_v17 }
 0x29a   : > { %1795 = vmatpush.bf16.msrb.mxu1 %v1782_v30 }
 0x29c   : > { %1444 = vmatpush.bf16.msrb.mxu0 %v1782_v30 }
 0x29d   : > { %1241 = vmatmul.bf16.gmra.mxu1 %v2397_v20 }
 0x29f   : > { %1222 = vmatmul.bf16.gmra.mxu0 %v2397_v20 }
 0x2a9   : > { %1260 = vmatmul.bf16.gmra.mxu2 %v2397_v20 }
 0x30a   : > { %v1237_v24 = vpop.f32.mrf.mxu1 }
 0x30c   : > { %v1218_v28 = vpop.f32.mrf.mxu0 }
 0x312   : > { %v1239_v21 = vpop.f32.mrf.mxu1 }
 0x313   : > { %v1268_v34 = vpack.c.bf16 %v1239_v21, %v1237_v24 }
 0x314   : > { %v1220_v36 = vpop.f32.mrf.mxu0 }
 0x315   : > { %v1266_v37 = vpack.c.bf16 %v1220_v36, %v1218_v28 }
 0x31a   : > { %v1242_v22 = vpop.f32.mrf.mxu1 }
 0x31c   : > { %v1223_v40 = vpop.f32.mrf.mxu0 }
 0x322   : > { %v1244_v31 = vpop.f32.mrf.mxu1 }
 0x323   : > { %v1269_v33 = vpack.c.bf16 %v1244_v31, %v1242_v22 }
 0x324   : > { %v1225_v41 = vpop.f32.mrf.mxu0 }
 0x325   : > { %1280 = vmatpush.bf16.xpose.msra.mxu3 %v1269_v33  ;;  %v1267_v42 = vpack.c.bf16 %v1225_v41, %v1223_v40  ;;  %v1256_v41 = vpop.f32.mrf.mxu2 }
 0x32d   : > { %1281 = vmatpush.bf16.xpose.msra.mxu3 %v1268_v34  ;;  %v1258_v48 = vpop.f32.mrf.mxu2 }
 0x32e   : > { %v1340_v23 = vpack.c.bf16 %v1258_v48, %v1256_v41 }
 0x334   : > { %1282 = vmatmul.bf16.vlgmr.msra.gmra.mxu3 %v1266_v37 }
 0x335   : > { %v1261_v46 = vpop.f32.mrf.mxu2 }
 0x33d   : > { %v1263_v49 = vpop.f32.mrf.mxu2 }
 0x33e   : > { %v1341_v50 = vpack.c.bf16 %v1263_v49, %v1261_v46 }
 0x340   : > { %1354 = vmatpush.bf16.msrb.mxu3 %v1341_v50 }
 0x344   : > { %1287 = vmatmul.bf16.gmra.mxu3 %v1267_v42 }
 0x345   : > { %1355 = vmatpush.bf16.msrb.mxu3 %v1340_v23 }
 0x3b7   : > { %v1283_v5 = vpop.f32.mrf.mxu3 }
 0x3b8   : > { %v1284_v32 = vadd.f32 %v1283_v5, %v1270_v27 }
 0x3ba   : > { %v1294_v62 = vsel %vm1293_vm1, %v1284_v32, -inf }
 0x3bb   : > { %1295 = vmax.xlane.f32.xlu0 %v1294_v62 }
 0x3bf   : > { %v1285_v7 = vpop.f32.mrf.mxu3 }
 0x3c0   : > { %v1286_v26 = vadd.f32 %v1285_v7, %v1271_v52  ;;  %v1780_v7 = vld [vmem:[%s1915_s24 + $0x10] sm:$0xff] }
 0x3c2   : > { %v1297_v11 = vsel %vm1293_vm1, %v1286_v26, -inf }
 0x3c3   : > { %1298 = vmax.xlane.f32.xlu0 %v1297_v11 }
 0x3c7   : > { %v1288_v63 = vpop.f32.mrf.mxu3 }
 0x3c8   : > { %v1289_v8 = vadd.f32 %v1288_v63, %v1272_v6 }
 0x3ca   : > { %v1300_v53 = vsel %vm1293_vm1, %v1289_v8, -inf }
 0x3cb   : > { %1301 = vmax.xlane.f32.xlu1 %v1300_v53 }
 0x3cf   : > { %v1290_v47 = vpop.f32.mrf.mxu3 }
 0x3d0   : > { %v1291_v61 = vadd.f32 %v1290_v47, %v1273_v2 }
 0x3d2   : > { %v1303_v9 = vsel %vm1293_vm1, %v1291_v61, -inf }
 0x3d3   : > { %1304 = vmax.xlane.f32.xlu1 %v1303_v9 }
 0x42e   : > { %v1296_v43 = vpop.xlane.xlu0 %1295 }
 0x42f   : > { %v1306_v10 = vsub.f32 %v1284_v32, %v1296_v43  ;;  %v1781_v32 = vld [vmem:[%s1915_s24 + $0x18] sm:$0xff] }
 0x430   : > { %1445 = vmatpush.bf16.msrb.mxu0 %v1781_v32  ;;  %1796 = vmatpush.bf16.msrb.mxu1 %v1781_v32 }
 0x431   : > { %v1310_v16 = vmul.f32 1.442695, %v1306_v10 }
 0x433   : > { %1812 = vpow2.f32 %v1310_v16 }
 0x434   : > { %1446 = vmatpush.bf16.msrb.mxu0 %v1780_v7  ;;  %1797 = vmatpush.bf16.msrb.mxu1 %v1780_v7 }
 0x436   : > { %v1299_v25 = vpop.xlane.xlu0 %1298 }
 0x437   : > { %v1307_v38 = vsub.f32 %v1286_v26, %v1299_v25  ;;  %v1778_v26 = vld [vmem:[%s1915_s24] sm:$0xff] }
 0x438   : > { %1447 = vmatpush.bf16.msrb.mxu0 %v1779_v1  ;;  %1798 = vmatpush.bf16.msrb.mxu1 %v1779_v1 }
 0x439   : > { %v1813_v18 = vpop.eup %1812  ;;  %v1312_v17 = vmul.f32 1.442695, %v1307_v38 }
 0x43a   : > { %v1318_v24 = vsel %vm1293_vm1, %v1813_v18, 0.0 }
 0x43b   : > { %1814 = vpow2.f32 %v1312_v17  ;;  %1319 = vadd.xlane.f32.xlu2 %v1318_v24 }
 0x43c   : > { %1448 = vmatpush.bf16.msrb.mxu0 %v1778_v26  ;;  %1799 = vmatpush.bf16.msrb.mxu1 %v1778_v26 }
 0x43e   : > { %v1302_v21 = vpop.xlane.xlu1 %1301 }
 0x43f   : > { %v1308_v22 = vsub.f32 %v1289_v8, %v1302_v21 }
 0x441   : > { %v1815_v28 = vpop.eup %1814  ;;  %v1314_v31 = vmul.f32 1.442695, %v1308_v22 }
 0x442   : > { %v1321_v33 = vsel %vm1293_vm1, %v1815_v28, 0.0 }
 0x443   : > { %1816 = vpow2.f32 %v1314_v31  ;;  %1322 = vadd.xlane.f32.xlu2 %v1321_v33 }
 0x446   : > { %v1305_v20 = vpop.xlane.xlu1 %1304 }
 0x447   : > { %v1309_v34 = vsub.f32 %v1291_v61, %v1305_v20  ;;  %v1811_v61 = vld [vmem:[%s405_s27] ss:$0 sm:$0xff] }
 0x449   : > { %v1817_v36 = vpop.eup %1816  ;;  %v1316_v37 = vmul.f32 1.442695, %v1309_v34 }
 0x44a   : > { %v1324_v40 = vsel %vm1293_vm1, %v1817_v36, 0.0 }
 0x44b   : > { %1818 = vpow2.f32 %v1316_v37  ;;  %1325 = vadd.xlane.f32.xlu0 %v1324_v40 }
 0x451   : > { %v1819_v42 = vpop.eup %1818 }
 0x452   : > { %v1327_v45 = vsel %vm1293_vm1, %v1819_v42, 0.0 }
 0x453   : > { %1328 = vadd.xlane.f32.xlu1 %v1327_v45 }
 0x4ae   : > { %v1320_v51 = vpop.xlane.xlu2 %1319 }
 0x4af   : > { %1820 = vrcp.f32 %v1320_v51 }
 0x4b5   : > { %v1821_v58 = vpop.eup %1820 }
 0x4b6   : > { %v1323_v13 = vpop.xlane.xlu2 %1322  ;;  %v1334_v27 = vmul.f32 %v1821_v58, %v1813_v18 }
 0x4b7   : > { %1822 = vrcp.f32 %v1323_v13 }
 0x4bd   : > { %v1823_v59 = vpop.eup %1822 }
 0x4be   : > { %v1335_v5 = vmul.f32 %v1823_v59, %v1815_v28  ;;  %v1326_v54 = vpop.xlane.xlu0 %1325 }
 0x4bf   : > { %1824 = vrcp.f32 %v1326_v54 }
 0x4c0   : > { %v1338_v60 = vpack.c.bf16 %v1335_v5, %v1334_v27 }
 0x4c2   : > { %1705 = vmatmul.msk.bf16.vlgmr.msrb.gmra.mxu3 %vm1293_vm1, %v1338_v60 }
 0x4c5   : > { %v1825_v62 = vpop.eup %1824 }
 0x4c6   : > { %v1329_v0 = vpop.xlane.xlu1 %1328  ;;  %v1336_v35 = vmul.f32 %v1825_v62, %v1817_v36 }
 0x4c7   : > { %1826 = vrcp.f32 %v1329_v0 }
 0x4cd   : > { %v1827_v14 = vpop.eup %1826 }
 0x4ce   : > { %v1337_v44 = vmul.f32 %v1827_v14, %v1819_v42 }
 0x4d0   : > { %v1339_v52 = vpack.c.bf16 %v1337_v44, %v1336_v35 }
 0x4d2   : > { %1706 = vmatmul.msk.bf16.gmra.mxu3 %vm1293_vm1, %v1339_v52 }
 0x545   : > { %v1357_v4 = vpop.f32.mrf.mxu3 }
 0x546   : > { %v1367_v11 = vadd.f32 %v1357_v4, %v2379_v12 }
 0x54d   : > { %v1359_v39 = vpop.f32.mrf.mxu3 }
 0x54e   : > { %v1368_v3 = vadd.f32 %v1359_v39, %v2381_v15 }
 0x550   : > { %v1371_v6 = vpack.c.bf16 %v1368_v3, %v1367_v11 }
 0x552   : > { %1449 = vmatmul.bf16.vlgmr.msrb.gmra.mxu0 %v1371_v6 }
 0x555   : > { %v1362_v63 = vpop.f32.mrf.mxu3 }
 0x556   : > { %v1369_v53 = vadd.f32 %v1362_v63, %v2391_v29 }
 0x55d   : > { %v1364_v8 = vpop.f32.mrf.mxu3 }
 0x55e   : > { %v1370_v2 = vadd.f32 %v1364_v8, %v2393_v19 }
 0x560   : > { %v1372_v47 = vpack.c.bf16 %v1370_v2, %v1369_v53 }
 0x562   : > { %1454 = vmatmul.bf16.vlgmr.msrb.gmra.mxu1 %v1372_v47 }
 0x5cf   : > { %v1450_v9 = vpop.f32.mrf.mxu0 }
 0x5d0   : > { %v1451_v43 = vadd.f32 %v1811_v61, %v1450_v9 }
 0x5d7   : > { %v1452_v12 = vpop.f32.mrf.mxu0 }
 0x5d8   : > { %v1453_v10 = vadd.f32 %v1811_v61, %v1452_v12 }
 0x5df   : > { %v1455_v15 = vpop.f32.mrf.mxu1 }
 0x5e0   : > { %v1456_v16 = vadd.f32 %v1811_v61, %v1455_v15 }
 0x5e4   : > { %1464 = sbr.rel (%p1739_p5) target bundleno = 1519 (0x5ef), region = 72 }
 0x5e7   : > { %v1457_v25 = vpop.f32.mrf.mxu1 }
 0x5e8   : > { %v1458_v38 = vadd.f32 %v1811_v61, %v1457_v25 }
 0x5e9   : > { %v1465_v29 = vmax.f32 %v1451_v43, 0.0  ;;  %v1466_v19 = vmax.f32 %v1453_v10, 0.0  ;;  %v1467_v18 = vmax.f32 %v1456_v16, 0.0 }
 0x5ea   : > { %v1468_v17 = vmax.f32 %v1458_v38, 0.0 }
 0x5eb   : > { %1469 = vst [vmem:[#allocation2 + $0x10] sm:$0xff] %v1465_v29 }
 0x5ec   : > { %1470 = vst [vmem:[#allocation2] sm:$0xff] %v1466_v19 }
 0x5ed   : > { %1471 = vst [vmem:[#allocation2 + $0x18] sm:$0xff] %v1467_v18 }
 0x5ee   : > { %1472 = vst [vmem:[#allocation2 + $0x8] sm:$0xff] %v1468_v17 }
 0x5ef PF: > { %p1740_p6 = scmp.ne.s32.totalorder %s1902_s18, 3 }
 0x5f1   : > { %1475 = sbr.rel (%p1740_p6) target bundleno = 1530 (0x5fa), region = 76 }
 0x5f6   : > { %1476 = vst [vmem:[%s2486_s11] sm:$0xff] %v1451_v43 }
 0x5f7   : > { %1477 = vst [vmem:[%s2486_s11 + $0x8] sm:$0xff] %v1453_v10 }
 0x5f8   : > { %1478 = vst [vmem:[%s2486_s11 + $0x10] sm:$0xff] %v1456_v16 }
 0x5f9   : > { %1479 = vst [vmem:[%s2486_s11 + $0x18] sm:$0xff] %v1458_v38 }
 0x5fa PF: > { %s21_s17 = sadd.s32 1, %s1834_s17  }
 0x5fb   : > { %p18_p7 = scmp.ge.s32.totalorder %s21_s17, 6  }
 0x5fd   :  { %20 = sbr.rel (!%p18_p7) target bundleno = 1 (0x1), region = 108 }

</bundles_post_ra>
